<compile_context>
chip_gen: v6e
topology: v6e:2x2x1
jax: 0.10.0
libtpu: 0.0.40
codegen_flags: <defaults>
</compile_context>

<pallas_src>
import functools

import jax
import jax.numpy as jnp
from jax import lax
from jax.experimental import pallas as pl
from jax.experimental.pallas import tpu as pltpu

LN_EPS = 1e-5  # nn.LayerNorm default


def _layer_norm(x, g, b):
    mu = jnp.mean(x, axis=-1, keepdims=True)
    var = jnp.mean((x - mu) ** 2, axis=-1, keepdims=True)
    return (x - mu) * lax.rsqrt(var + LN_EPS) * g + b


# --------------------------------------------------------------------------
# Kernel: one query tile of one batch element of a full BEiT block
# --------------------------------------------------------------------------
def _beit_block_kernel(x_ref, ln1g_ref, ln1b_ref, wqkv_ref, bqkv_ref,
                       wo_ref, bo_ref, g1_ref, ln2g_ref, ln2b_ref,
                       w1_ref, b1_ref, w2_ref, b2_ref, g2_ref,
                       o_ref,
                       qh_ref, kh_ref, vh_ref, oh_ref,
                       *, num_heads, head_dim, tq):
    """x_ref: (1, N, C) block.  Grid = (B, N // tq); q axis is 'arbitrary'.

    wqkv: (C, 3C) bf16 (attn scale folded into the Q columns)
    bqkv: (1, 3C) f32  ([q_bias*scale, 0, v_bias])
    wo:   (C, C) bf16   w1: (C, hidden) bf16   w2: (hidden, C) bf16
    scratch: qh/kh/vh (nh, N, hd) bf16, oh (nh, tq, hd) bf16
    """
    C = num_heads * head_dim
    qt = pl.program_id(1)

    # ---- prologue, once per batch element: LN1 + fused QKV over full seq ----
    @pl.when(qt == 0)
    def _prologue():
        x_full = x_ref[0].astype(jnp.float32)                       # (N, C)
        xn = _layer_norm(x_full, ln1g_ref[...], ln1b_ref[...])
        # Single lane-dense (N, C) @ (C, 3C) MXU matmul for Q, K and V.
        qkv = jnp.dot(xn.astype(jnp.bfloat16), wqkv_ref[...],
                      preferred_element_type=jnp.float32) + bqkv_ref[...]
        # Cheap static relayout into head-major bf16 scratch (once per b).
        for h in range(num_heads):
            lo, hi = h * head_dim, (h + 1) * head_dim
            qh_ref[h] = qkv[:, lo:hi].astype(jnp.bfloat16)
            kh_ref[h] = qkv[:, C + lo:C + hi].astype(jnp.bfloat16)
            vh_ref[h] = qkv[:, 2 * C + lo:2 * C + hi].astype(jnp.bfloat16)

    q0 = pl.multiple_of(qt * tq, tq)
    x_tile = x_ref[0, pl.ds(q0, tq), :].astype(jnp.float32)         # shortcut

    # ---- attention: real loop over heads bounds the (tq, N) live range ------
    @pl.loop(0, num_heads)
    def _head(h):
        q_h = qh_ref[h, pl.ds(q0, tq), :]                           # (tq, hd)
        s = lax.dot_general(q_h, kh_ref[h],
                            dimension_numbers=(((1,), (1,)), ((), ())),
                            preferred_element_type=jnp.float32)     # (tq, N)
        s = s - jnp.max(s, axis=-1, keepdims=True)
        p = jnp.exp(s)
        inv = pl.reciprocal(jnp.sum(p, axis=-1, keepdims=True), approx=False)
        oh_ref[h] = jnp.dot((p * inv).astype(jnp.bfloat16), vh_ref[h],
                            preferred_element_type=jnp.float32
                            ).astype(jnp.bfloat16)                  # (tq, hd)

    # ---- heads folded into a single full-depth (C, C) output projection -----
    o_cat = jnp.concatenate([oh_ref[i] for i in range(num_heads)], axis=-1)
    attn_out = jnp.dot(o_cat, wo_ref[...],
                       preferred_element_type=jnp.float32) + bo_ref[...]

    # ---- residual 1 with layer-scale gamma_1 (DropPath = identity) ----------
    y = x_tile + g1_ref[...] * attn_out

    # ---- LayerNorm 2 + MLP (bf16 GELU, f32 accumulation) --------------------
    yn = _layer_norm(y, ln2g_ref[...], ln2b_ref[...])
    h1 = jnp.dot(yn.astype(jnp.bfloat16), w1_ref[...],
                 preferred_element_type=jnp.float32) + b1_ref[...]
    # TODO(synk): nn.GELU default is exact erf; tanh approximation used for
    # guaranteed Mosaic lowering (max abs deviation ~3e-3).
    h1 = jax.nn.gelu(h1.astype(jnp.bfloat16), approximate=True)
    h2 = jnp.dot(h1, w2_ref[...],
                 preferred_element_type=jnp.float32) + b2_ref[...]

    # ---- residual 2 with layer-scale gamma_2 ---------------------------------
    o_ref[0] = (y + g2_ref[...] * h2).astype(o_ref.dtype)


# --------------------------------------------------------------------------
# Wrapper
# --------------------------------------------------------------------------
def block_for_beit_forward(x, kp, num_heads, *, tq=128):
    """x: (B, H, W, C) f32 -> (B, H, W, C) f32."""
    B, H, W, C = x.shape
    N = H * W
    assert C % num_heads == 0
    hd = C // num_heads
    hidden = kp["w_fc1"].shape[1]
    tq = min(tq, N)
    assert N % tq == 0 and tq % 8 == 0
    n_q = N // tq
    x_tok = x.reshape(B, N, C)

    def full(*shape):
        return pl.BlockSpec(shape, lambda b, q, _s=shape: (0,) * len(_s))

    kernel = functools.partial(_beit_block_kernel, num_heads=num_heads,
                               head_dim=hd, tq=tq)

    flops = B * (2 * N * C * 3 * C        # fused QKV projection
                 + 4 * N * N * C          # scores + P@V over all heads
                 + 2 * N * C * C          # output projection
                 + 4 * N * C * hidden)    # MLP fc1 + fc2
    transcendentals = B * (num_heads * N * N + N * hidden)
    bytes_accessed = (8 * B * N * C                              # x in + out
                      + 2 * (4 * C * C + 2 * C * hidden)         # bf16 weights
                      + 4 * (11 * C + hidden))                   # f32 vectors

    out = pl.pallas_call(
        kernel,
        out_shape=jax.ShapeDtypeStruct((B, N, C), jnp.float32),
        grid_spec=pltpu.PrefetchScalarGridSpec(
            num_scalar_prefetch=0,
            grid=(B, n_q),
            in_specs=[
                pl.BlockSpec((1, N, C), lambda b, q: (b, 0, 0)),   # x (full seq/b)
                full(1, C), full(1, C),                            # ln1 g / b
                full(C, 3 * C),                                    # fused Wqkv
                full(1, 3 * C),                                    # fused qkv bias
                full(C, C), full(1, C),                            # Wo / bo
                full(1, C),                                        # gamma_1
                full(1, C), full(1, C),                            # ln2 g / b
                full(C, hidden), full(1, hidden),                  # fc1 w / b
                full(hidden, C), full(1, C),                       # fc2 w / b
                full(1, C),                                        # gamma_2
            ],
            out_specs=pl.BlockSpec((1, tq, C), lambda b, q: (b, q, 0)),
            scratch_shapes=[
                pltpu.VMEM((num_heads, N, hd), jnp.bfloat16),      # Q heads
                pltpu.VMEM((num_heads, N, hd), jnp.bfloat16),      # K heads
                pltpu.VMEM((num_heads, N, hd), jnp.bfloat16),      # V heads
                pltpu.VMEM((num_heads, tq, hd), jnp.bfloat16),     # per-head out
            ]),
        compiler_params=pltpu.CompilerParams(
            dimension_semantics=("parallel", "arbitrary"),
            vmem_limit_bytes=32 * 1024 * 1024),
        cost_estimate=pl.CostEstimate(flops=flops,
                                      transcendentals=transcendentals,
                                      bytes_accessed=bytes_accessed),
    )(x_tok, kp["ln1_g"], kp["ln1_b"], kp["w_qkv"], kp["b_qkv"],
      kp["w_o"], kp["b_o"], kp["gamma1"], kp["ln2_g"], kp["ln2_b"],
      kp["w_fc1"], kp["b_fc1"], kp["w_fc2"], kp["b_fc2"], kp["gamma2"])
    return out.reshape(B, H, W, C)


# --------------------------------------------------------------------------
# Parameters: torch-like f32 "raw" params, then a one-time kernel-ready prep
# (fused QKV weight, attention scale folded in, bf16 matmul weights).
# --------------------------------------------------------------------------
def init_raw_params(key, dim, num_heads, mlp_ratio=4.0, init_values=0.1):
    hidden = int(dim * mlp_ratio)
    ks = jax.random.split(key, 8)
    nrm = lambda k, s, std=0.02: std * jax.random.normal(k, s, jnp.float32)
    return {
        "ln1_g": jnp.ones((dim,), jnp.float32),
        "ln1_b": jnp.zeros((dim,), jnp.float32),
        "w_qkv": nrm(ks[0], (dim, 3 * dim)),      # columns = [Wq | Wk | Wv]
        "q_bias": nrm(ks[1], (dim,)),
        "v_bias": nrm(ks[2], (dim,)),
        "w_proj": nrm(ks[3], (dim, dim)),
        "b_proj": nrm(ks[4], (dim,)),
        "ln2_g": jnp.ones((dim,), jnp.float32),
        "ln2_b": jnp.zeros((dim,), jnp.float32),
        "w_fc1": nrm(ks[5], (dim, hidden)),
        "b_fc1": nrm(ks[6], (hidden,)),
        "w_fc2": nrm(ks[7], (hidden, dim)),
        "b_fc2": jnp.zeros((dim,), jnp.float32),
        "gamma1": jnp.full((dim,), init_values, jnp.float32),
        "gamma2": jnp.full((dim,), init_values, jnp.float32),
    }


def prepare_kernel_params(raw, num_heads):
    dim = raw["w_proj"].shape[0]
    hd = dim // num_heads
    scale = hd ** (-0.5)
    # One-time transforms (review): fold attn scale into Wq / q_bias, build
    # the fused qkv bias [q_bias*scale, 0, v_bias], cast matmul weights bf16.
    w_qkv = jnp.concatenate([raw["w_qkv"][:, :dim] * scale,
                             raw["w_qkv"][:, dim:]], axis=-1)
    b_qkv = jnp.concatenate([raw["q_bias"] * scale,
                             jnp.zeros_like(raw["q_bias"]), raw["v_bias"]])
    r2 = lambda a: a[None, :]
    return {
        "ln1_g": r2(raw["ln1_g"]), "ln1_b": r2(raw["ln1_b"]),
        "w_qkv": w_qkv.astype(jnp.bfloat16),
        "b_qkv": r2(b_qkv).astype(jnp.float32),
        "w_o": raw["w_proj"].astype(jnp.bfloat16), "b_o": r2(raw["b_proj"]),
        "gamma1": r2(raw["gamma1"]),
        "ln2_g": r2(raw["ln2_g"]), "ln2_b": r2(raw["ln2_b"]),
        "w_fc1": raw["w_fc1"].astype(jnp.bfloat16), "b_fc1": r2(raw["b_fc1"]),
        "w_fc2": raw["w_fc2"].astype(jnp.bfloat16), "b_fc2": r2(raw["b_fc2"]),
        "gamma2": r2(raw["gamma2"]),
    }


# --------------------------------------------------------------------------
# Pure-JAX reference (mirrors the PyTorch forward; f32 math, exact GELU)
# --------------------------------------------------------------------------
def ref_forward(x, raw, num_heads):
    B, H, W, C = x.shape
    N = H * W
    hd = C // num_heads
    scale = hd ** (-0.5)
    xt = x.reshape(B, N, C).astype(jnp.float32)

    xn = _layer_norm(xt, raw["ln1_g"], raw["ln1_b"])
    qkv_bias = jnp.concatenate([raw["q_bias"], jnp.zeros_like(raw["v_bias"]),
                                raw["v_bias"]])
    qkv = xn @ raw["w_qkv"] + qkv_bias
    q, k, v = jnp.split(qkv, 3, axis=-1)
    heads = lambda t: t.reshape(B, N, num_heads, hd).transpose(0, 2, 1, 3)
    q, k, v = heads(q), heads(k), heads(v)
    attn = jax.nn.softmax((q * scale) @ jnp.swapaxes(k, -1, -2), axis=-1)
    o = (attn @ v).transpose(0, 2, 1, 3).reshape(B, N, C)
    proj = o @ raw["w_proj"] + raw["b_proj"]
    y = xt + raw["gamma1"] * proj

    yn = _layer_norm(y, raw["ln2_g"], raw["ln2_b"])
    h1 = jax.nn.gelu(yn @ raw["w_fc1"] + raw["b_fc1"], approximate=False)
    out = y + raw["gamma2"] * (h1 @ raw["w_fc2"] + raw["b_fc2"])
    return out.reshape(B, H, W, C)


# --------------------------------------------------------------------------
if __name__ == "__main__":
    key = jax.random.PRNGKey(0)
    B, H, W = 2, 8, 8            # N = 64 tokens
    dim, num_heads = 128, 4      # head_dim = 32, mlp hidden = 512

    kx, kparams = jax.random.split(key)
    x = jax.random.normal(kx, (B, H, W, dim), jnp.float32)
    raw = init_raw_params(kparams, dim, num_heads)
    kernel_params = prepare_kernel_params(raw, num_heads)

    out = block_for_beit_forward(x, kernel_params, num_heads, tq=32)
    jax.block_until_ready(out)
    assert out.shape == (B, H, W, dim)

    ref = ref_forward(x, raw, num_heads)
    max_err = float(jnp.max(jnp.abs(out - ref)))
    assert jnp.allclose(out, ref, atol=2e-2, rtol=2e-2), f"max_err={max_err}"

    print("KERNEL_OK")
</pallas_src>

<mosaic_0001>
module attributes {stable_mosaic.version = 11 : i64} {
  func.func @_beit_block_kernel(%arg0: i32, %arg1: i32, %arg2: memref<1x64x128xf32, #tpu.memory_space<vmem>>, %arg3: memref<1x128xf32, #tpu.memory_space<vmem>>, %arg4: memref<1x128xf32, #tpu.memory_space<vmem>>, %arg5: memref<128x384xbf16, #tpu.memory_space<vmem>>, %arg6: memref<1x384xf32, #tpu.memory_space<vmem>>, %arg7: memref<128x128xbf16, #tpu.memory_space<vmem>>, %arg8: memref<1x128xf32, #tpu.memory_space<vmem>>, %arg9: memref<1x128xf32, #tpu.memory_space<vmem>>, %arg10: memref<1x128xf32, #tpu.memory_space<vmem>>, %arg11: memref<1x128xf32, #tpu.memory_space<vmem>>, %arg12: memref<128x512xbf16, #tpu.memory_space<vmem>>, %arg13: memref<1x512xf32, #tpu.memory_space<vmem>>, %arg14: memref<512x128xbf16, #tpu.memory_space<vmem>>, %arg15: memref<1x128xf32, #tpu.memory_space<vmem>>, %arg16: memref<1x128xf32, #tpu.memory_space<vmem>>, %arg17: memref<1x32x128xf32, #tpu.memory_space<vmem>>, %arg18: memref<4x64x32xbf16, #tpu.memory_space<vmem>>, %arg19: memref<4x64x32xbf16, #tpu.memory_space<vmem>>, %arg20: memref<4x64x32xbf16, #tpu.memory_space<vmem>>, %arg21: memref<4x32x32xbf16, #tpu.memory_space<vmem>>) attributes {dimension_semantics = [#tpu.dimension_semantics<parallel>, #tpu.dimension_semantics<arbitrary>], iteration_bounds = array<i64: 2, 2>, scalar_prefetch = 0 : i64, scratch_operands = 4 : i64, tpu.core_type = #tpu.core_type<tc>, window_params = [{transform_indices = @transform_0, window_bounds = array<i64: 1, 64, 128>}, {pipeline_mode = #tpu.pipeline_mode<synchronous>, transform_indices = @transform_1, window_bounds = array<i64: 1, 128>}, {pipeline_mode = #tpu.pipeline_mode<synchronous>, transform_indices = @transform_2, window_bounds = array<i64: 1, 128>}, {pipeline_mode = #tpu.pipeline_mode<synchronous>, transform_indices = @transform_3, window_bounds = array<i64: 128, 384>}, {pipeline_mode = #tpu.pipeline_mode<synchronous>, transform_indices = @transform_4, window_bounds = array<i64: 1, 384>}, {pipeline_mode = #tpu.pipeline_mode<synchronous>, transform_indices = @transform_5, window_bounds = array<i64: 128, 128>}, {pipeline_mode = #tpu.pipeline_mode<synchronous>, transform_indices = @transform_6, window_bounds = array<i64: 1, 128>}, {pipeline_mode = #tpu.pipeline_mode<synchronous>, transform_indices = @transform_7, window_bounds = array<i64: 1, 128>}, {pipeline_mode = #tpu.pipeline_mode<synchronous>, transform_indices = @transform_8, window_bounds = array<i64: 1, 128>}, {pipeline_mode = #tpu.pipeline_mode<synchronous>, transform_indices = @transform_9, window_bounds = array<i64: 1, 128>}, {pipeline_mode = #tpu.pipeline_mode<synchronous>, transform_indices = @transform_10, window_bounds = array<i64: 128, 512>}, {pipeline_mode = #tpu.pipeline_mode<synchronous>, transform_indices = @transform_11, window_bounds = array<i64: 1, 512>}, {pipeline_mode = #tpu.pipeline_mode<synchronous>, transform_indices = @transform_12, window_bounds = array<i64: 512, 128>}, {pipeline_mode = #tpu.pipeline_mode<synchronous>, transform_indices = @transform_13, window_bounds = array<i64: 1, 128>}, {pipeline_mode = #tpu.pipeline_mode<synchronous>, transform_indices = @transform_14, window_bounds = array<i64: 1, 128>}, {transform_indices = @transform_15, window_bounds = array<i64: 1, 32, 128>}]} {
    %c0_i32 = arith.constant 0 : i32
    %0 = arith.cmpi eq, %arg1, %c0_i32 : i32
    %1 = arith.extui %0 : i1 to i32
    %c0_i32_0 = arith.constant 0 : i32
    %2 = arith.cmpi ne, %1, %c0_i32_0 : i32
    scf.if %2 {
      %c0_47 = arith.constant 0 : index
      %c0_48 = arith.constant 0 : index
      %c0_49 = arith.constant 0 : index
      %83 = vector.load %arg2[%c0_47, %c0_48, %c0_49] : memref<1x64x128xf32, #tpu.memory_space<vmem>>, vector<1x64x128xf32>
      %84 = vector.shape_cast %83 : vector<1x64x128xf32> to vector<64x128xf32>
      %c0_50 = arith.constant 0 : index
      %c0_51 = arith.constant 0 : index
      %85 = vector.load %arg3[%c0_50, %c0_51] : memref<1x128xf32, #tpu.memory_space<vmem>>, vector<1x128xf32>
      %c0_52 = arith.constant 0 : index
      %c0_53 = arith.constant 0 : index
      %86 = vector.load %arg4[%c0_52, %c0_53] : memref<1x128xf32, #tpu.memory_space<vmem>>, vector<1x128xf32>
      %cst_54 = arith.constant dense<0.000000e+00> : vector<64xf32>
      %87 = vector.multi_reduction <add>, %84, %cst_54 [1] : vector<64x128xf32> to vector<64xf32>
      %88 = vector.shape_cast %87 : vector<64xf32> to vector<64x1xf32>
      %cst_55 = arith.constant 1.280000e+02 : f32
      %89 = vector.broadcast %cst_55 : f32 to vector<64x1xf32>
      %90 = arith.divf %88, %89 : vector<64x1xf32>
      %91 = vector.broadcast %90 : vector<64x1xf32> to vector<64x128xf32>
      %92 = arith.subf %84, %91 : vector<64x128xf32>
      %93 = arith.mulf %92, %92 : vector<64x128xf32>
      %cst_56 = arith.constant dense<0.000000e+00> : vector<64xf32>
      %94 = vector.multi_reduction <add>, %93, %cst_56 [1] : vector<64x128xf32> to vector<64xf32>
      %95 = vector.shape_cast %94 : vector<64xf32> to vector<64x1xf32>
      %cst_57 = arith.constant 1.280000e+02 : f32
      %96 = vector.broadcast %cst_57 : f32 to vector<64x1xf32>
      %97 = arith.divf %95, %96 : vector<64x1xf32>
      %98 = vector.broadcast %90 : vector<64x1xf32> to vector<64x128xf32>
      %99 = arith.subf %84, %98 : vector<64x128xf32>
      %cst_58 = arith.constant 9.99999974E-6 : f32
      %100 = vector.broadcast %cst_58 : f32 to vector<64x1xf32>
      %101 = arith.addf %97, %100 : vector<64x1xf32>
      %102 = math.rsqrt %101 : vector<64x1xf32>
      %103 = vector.broadcast %102 : vector<64x1xf32> to vector<64x128xf32>
      %104 = arith.mulf %99, %103 : vector<64x128xf32>
      %105 = vector.broadcast %85 : vector<1x128xf32> to vector<64x128xf32>
      %106 = arith.mulf %104, %105 : vector<64x128xf32>
      %107 = vector.broadcast %86 : vector<1x128xf32> to vector<64x128xf32>
      %108 = arith.addf %106, %107 : vector<64x128xf32>
      %109 = arith.truncf %108 : vector<64x128xf32> to vector<64x128xbf16>
      %c0_59 = arith.constant 0 : index
      %c0_60 = arith.constant 0 : index
      %110 = vector.load %arg5[%c0_59, %c0_60] : memref<128x384xbf16, #tpu.memory_space<vmem>>, vector<128x384xbf16>
      %cst_61 = arith.constant dense<0.000000e+00> : vector<64x384xf32>
      %111 = tpu.matmul %109, %110, %cst_61 {dimension_numbers = #tpu.dot_dimension_numbers<[1], [0], [0], [1], [0, 0, 1, 1], [], []>} : vector<64x128xbf16>, vector<128x384xbf16>, vector<64x384xf32> -> vector<64x384xf32>
      %c0_62 = arith.constant 0 : index
      %c0_63 = arith.constant 0 : index
      %112 = vector.load %arg6[%c0_62, %c0_63] : memref<1x384xf32, #tpu.memory_space<vmem>>, vector<1x384xf32>
      %113 = vector.broadcast %112 : vector<1x384xf32> to vector<64x384xf32>
      %114 = arith.addf %111, %113 : vector<64x384xf32>
      %115 = vector.extract_strided_slice %114 {offsets = [0, 0], sizes = [64, 32], strides = [1, 1]} : vector<64x384xf32> to vector<64x32xf32>
      %116 = arith.truncf %115 : vector<64x32xf32> to vector<64x32xbf16>
      %c0_64 = arith.constant 0 : index
      %c0_65 = arith.constant 0 : index
      %c0_66 = arith.constant 0 : index
      %117 = vector.load %arg18[%c0_64, %c0_65, %c0_66] : memref<4x64x32xbf16, #tpu.memory_space<vmem>>, vector<1x64x32xbf16>
      %118 = vector.shape_cast %117 : vector<1x64x32xbf16> to vector<64x32xbf16>
      %119 = vector.shape_cast %116 : vector<64x32xbf16> to vector<1x64x32xbf16>
      tpu.vector_store %arg18[%c0_64, %c0_65, %c0_66], %119 {strides = array<i32>} : memref<4x64x32xbf16, #tpu.memory_space<vmem>>, vector<1x64x32xbf16>,
      %120 = vector.extract_strided_slice %114 {offsets = [0, 128], sizes = [64, 32], strides = [1, 1]} : vector<64x384xf32> to vector<64x32xf32>
      %121 = arith.truncf %120 : vector<64x32xf32> to vector<64x32xbf16>
      %c0_67 = arith.constant 0 : index
      %c0_68 = arith.constant 0 : index
      %c0_69 = arith.constant 0 : index
      %122 = vector.load %arg19[%c0_67, %c0_68, %c0_69] : memref<4x64x32xbf16, #tpu.memory_space<vmem>>, vector<1x64x32xbf16>
      %123 = vector.shape_cast %122 : vector<1x64x32xbf16> to vector<64x32xbf16>
      %124 = vector.shape_cast %121 : vector<64x32xbf16> to vector<1x64x32xbf16>
      tpu.vector_store %arg19[%c0_67, %c0_68, %c0_69], %124 {strides = array<i32>} : memref<4x64x32xbf16, #tpu.memory_space<vmem>>, vector<1x64x32xbf16>,
      %125 = vector.extract_strided_slice %114 {offsets = [0, 256], sizes = [64, 32], strides = [1, 1]} : vector<64x384xf32> to vector<64x32xf32>
      %126 = arith.truncf %125 : vector<64x32xf32> to vector<64x32xbf16>
      %c0_70 = arith.constant 0 : index
      %c0_71 = arith.constant 0 : index
      %c0_72 = arith.constant 0 : index
      %127 = vector.load %arg20[%c0_70, %c0_71, %c0_72] : memref<4x64x32xbf16, #tpu.memory_space<vmem>>, vector<1x64x32xbf16>
      %128 = vector.shape_cast %127 : vector<1x64x32xbf16> to vector<64x32xbf16>
      %129 = vector.shape_cast %126 : vector<64x32xbf16> to vector<1x64x32xbf16>
      tpu.vector_store %arg20[%c0_70, %c0_71, %c0_72], %129 {strides = array<i32>} : memref<4x64x32xbf16, #tpu.memory_space<vmem>>, vector<1x64x32xbf16>,
      %130 = vector.extract_strided_slice %114 {offsets = [0, 32], sizes = [64, 32], strides = [1, 1]} : vector<64x384xf32> to vector<64x32xf32>
      %131 = arith.truncf %130 : vector<64x32xf32> to vector<64x32xbf16>
      %c1_73 = arith.constant 1 : index
      %c0_74 = arith.constant 0 : index
      %c0_75 = arith.constant 0 : index
      %132 = vector.load %arg18[%c1_73, %c0_74, %c0_75] : memref<4x64x32xbf16, #tpu.memory_space<vmem>>, vector<1x64x32xbf16>
      %133 = vector.shape_cast %132 : vector<1x64x32xbf16> to vector<64x32xbf16>
      %134 = vector.shape_cast %131 : vector<64x32xbf16> to vector<1x64x32xbf16>
      tpu.vector_store %arg18[%c1_73, %c0_74, %c0_75], %134 {strides = array<i32>} : memref<4x64x32xbf16, #tpu.memory_space<vmem>>, vector<1x64x32xbf16>,
      %135 = vector.extract_strided_slice %114 {offsets = [0, 160], sizes = [64, 32], strides = [1, 1]} : vector<64x384xf32> to vector<64x32xf32>
      %136 = arith.truncf %135 : vector<64x32xf32> to vector<64x32xbf16>
      %c1_76 = arith.constant 1 : index
      %c0_77 = arith.constant 0 : index
      %c0_78 = arith.constant 0 : index
      %137 = vector.load %arg19[%c1_76, %c0_77, %c0_78] : memref<4x64x32xbf16, #tpu.memory_space<vmem>>, vector<1x64x32xbf16>
      %138 = vector.shape_cast %137 : vector<1x64x32xbf16> to vector<64x32xbf16>
      %139 = vector.shape_cast %136 : vector<64x32xbf16> to vector<1x64x32xbf16>
      tpu.vector_store %arg19[%c1_76, %c0_77, %c0_78], %139 {strides = array<i32>} : memref<4x64x32xbf16, #tpu.memory_space<vmem>>, vector<1x64x32xbf16>,
      %140 = vector.extract_strided_slice %114 {offsets = [0, 288], sizes = [64, 32], strides = [1, 1]} : vector<64x384xf32> to vector<64x32xf32>
      %141 = arith.truncf %140 : vector<64x32xf32> to vector<64x32xbf16>
      %c1_79 = arith.constant 1 : index
      %c0_80 = arith.constant 0 : index
      %c0_81 = arith.constant 0 : index
      %142 = vector.load %arg20[%c1_79, %c0_80, %c0_81] : memref<4x64x32xbf16, #tpu.memory_space<vmem>>, vector<1x64x32xbf16>
      %143 = vector.shape_cast %142 : vector<1x64x32xbf16> to vector<64x32xbf16>
      %144 = vector.shape_cast %141 : vector<64x32xbf16> to vector<1x64x32xbf16>
      tpu.vector_store %arg20[%c1_79, %c0_80, %c0_81], %144 {strides = array<i32>} : memref<4x64x32xbf16, #tpu.memory_space<vmem>>, vector<1x64x32xbf16>,
      %145 = vector.extract_strided_slice %114 {offsets = [0, 64], sizes = [64, 32], strides = [1, 1]} : vector<64x384xf32> to vector<64x32xf32>
      %146 = arith.truncf %145 : vector<64x32xf32> to vector<64x32xbf16>
      %c2_82 = arith.constant 2 : index
      %c0_83 = arith.constant 0 : index
      %c0_84 = arith.constant 0 : index
      %147 = vector.load %arg18[%c2_82, %c0_83, %c0_84] : memref<4x64x32xbf16, #tpu.memory_space<vmem>>, vector<1x64x32xbf16>
      %148 = vector.shape_cast %147 : vector<1x64x32xbf16> to vector<64x32xbf16>
      %149 = vector.shape_cast %146 : vector<64x32xbf16> to vector<1x64x32xbf16>
      tpu.vector_store %arg18[%c2_82, %c0_83, %c0_84], %149 {strides = array<i32>} : memref<4x64x32xbf16, #tpu.memory_space<vmem>>, vector<1x64x32xbf16>,
      %150 = vector.extract_strided_slice %114 {offsets = [0, 192], sizes = [64, 32], strides = [1, 1]} : vector<64x384xf32> to vector<64x32xf32>
      %151 = arith.truncf %150 : vector<64x32xf32> to vector<64x32xbf16>
      %c2_85 = arith.constant 2 : index
      %c0_86 = arith.constant 0 : index
      %c0_87 = arith.constant 0 : index
      %152 = vector.load %arg19[%c2_85, %c0_86, %c0_87] : memref<4x64x32xbf16, #tpu.memory_space<vmem>>, vector<1x64x32xbf16>
      %153 = vector.shape_cast %152 : vector<1x64x32xbf16> to vector<64x32xbf16>
      %154 = vector.shape_cast %151 : vector<64x32xbf16> to vector<1x64x32xbf16>
      tpu.vector_store %arg19[%c2_85, %c0_86, %c0_87], %154 {strides = array<i32>} : memref<4x64x32xbf16, #tpu.memory_space<vmem>>, vector<1x64x32xbf16>,
      %155 = vector.extract_strided_slice %114 {offsets = [0, 320], sizes = [64, 32], strides = [1, 1]} : vector<64x384xf32> to vector<64x32xf32>
      %156 = arith.truncf %155 : vector<64x32xf32> to vector<64x32xbf16>
      %c2_88 = arith.constant 2 : index
      %c0_89 = arith.constant 0 : index
      %c0_90 = arith.constant 0 : index
      %157 = vector.load %arg20[%c2_88, %c0_89, %c0_90] : memref<4x64x32xbf16, #tpu.memory_space<vmem>>, vector<1x64x32xbf16>
      %158 = vector.shape_cast %157 : vector<1x64x32xbf16> to vector<64x32xbf16>
      %159 = vector.shape_cast %156 : vector<64x32xbf16> to vector<1x64x32xbf16>
      tpu.vector_store %arg20[%c2_88, %c0_89, %c0_90], %159 {strides = array<i32>} : memref<4x64x32xbf16, #tpu.memory_space<vmem>>, vector<1x64x32xbf16>,
      %160 = vector.extract_strided_slice %114 {offsets = [0, 96], sizes = [64, 32], strides = [1, 1]} : vector<64x384xf32> to vector<64x32xf32>
      %161 = arith.truncf %160 : vector<64x32xf32> to vector<64x32xbf16>
      %c3_91 = arith.constant 3 : index
      %c0_92 = arith.constant 0 : index
      %c0_93 = arith.constant 0 : index
      %162 = vector.load %arg18[%c3_91, %c0_92, %c0_93] : memref<4x64x32xbf16, #tpu.memory_space<vmem>>, vector<1x64x32xbf16>
      %163 = vector.shape_cast %162 : vector<1x64x32xbf16> to vector<64x32xbf16>
      %164 = vector.shape_cast %161 : vector<64x32xbf16> to vector<1x64x32xbf16>
      tpu.vector_store %arg18[%c3_91, %c0_92, %c0_93], %164 {strides = array<i32>} : memref<4x64x32xbf16, #tpu.memory_space<vmem>>, vector<1x64x32xbf16>,
      %165 = vector.extract_strided_slice %114 {offsets = [0, 224], sizes = [64, 32], strides = [1, 1]} : vector<64x384xf32> to vector<64x32xf32>
      %166 = arith.truncf %165 : vector<64x32xf32> to vector<64x32xbf16>
      %c3_94 = arith.constant 3 : index
      %c0_95 = arith.constant 0 : index
      %c0_96 = arith.constant 0 : index
      %167 = vector.load %arg19[%c3_94, %c0_95, %c0_96] : memref<4x64x32xbf16, #tpu.memory_space<vmem>>, vector<1x64x32xbf16>
      %168 = vector.shape_cast %167 : vector<1x64x32xbf16> to vector<64x32xbf16>
      %169 = vector.shape_cast %166 : vector<64x32xbf16> to vector<1x64x32xbf16>
      tpu.vector_store %arg19[%c3_94, %c0_95, %c0_96], %169 {strides = array<i32>} : memref<4x64x32xbf16, #tpu.memory_space<vmem>>, vector<1x64x32xbf16>,
      %170 = vector.extract_strided_slice %114 {offsets = [0, 352], sizes = [64, 32], strides = [1, 1]} : vector<64x384xf32> to vector<64x32xf32>
      %171 = arith.truncf %170 : vector<64x32xf32> to vector<64x32xbf16>
      %c3_97 = arith.constant 3 : index
      %c0_98 = arith.constant 0 : index
      %c0_99 = arith.constant 0 : index
      %172 = vector.load %arg20[%c3_97, %c0_98, %c0_99] : memref<4x64x32xbf16, #tpu.memory_space<vmem>>, vector<1x64x32xbf16>
      %173 = vector.shape_cast %172 : vector<1x64x32xbf16> to vector<64x32xbf16>
      %174 = vector.shape_cast %171 : vector<64x32xbf16> to vector<1x64x32xbf16>
      tpu.vector_store %arg20[%c3_97, %c0_98, %c0_99], %174 {strides = array<i32>} : memref<4x64x32xbf16, #tpu.memory_space<vmem>>, vector<1x64x32xbf16>,
    } else {
    }
    %c32_i32 = arith.constant 32 : i32
    %3 = arith.muli %arg1, %c32_i32 : i32
    %4 = tpu.assume_multiple %3, 32 : i32
    %c0 = arith.constant 0 : index
    %5 = arith.index_cast %4 : i32 to index
    %c0_1 = arith.constant 0 : index
    %6 = vector.load %arg2[%c0, %5, %c0_1] : memref<1x64x128xf32, #tpu.memory_space<vmem>>, vector<1x32x128xf32>
    %7 = vector.shape_cast %6 : vector<1x32x128xf32> to vector<32x128xf32>
    %c0_i32_2 = arith.constant 0 : i32
    %c4_i32 = arith.constant 4 : i32
    %8 = arith.addi %c0_i32_2, %c4_i32 : i32
    %c1_i32 = arith.constant 1 : i32
    scf.for %arg22 = %c0_i32_2 to %8 step %c1_i32  : i32 {
      %c1_i32_47 = arith.constant 1 : i32
      %83 = arith.muli %arg22, %c1_i32_47 : i32
      %c0_i32_48 = arith.constant 0 : i32
      %84 = arith.addi %c0_i32_48, %83 : i32
      %85 = arith.index_cast %84 : i32 to index
      %86 = arith.index_cast %4 : i32 to index
      %c0_49 = arith.constant 0 : index
      %87 = vector.load %arg18[%85, %86, %c0_49] : memref<4x64x32xbf16, #tpu.memory_space<vmem>>, vector<1x32x32xbf16>
      %88 = vector.shape_cast %87 : vector<1x32x32xbf16> to vector<32x32xbf16>
      %89 = arith.index_cast %84 : i32 to index
      %c0_50 = arith.constant 0 : index
      %c0_51 = arith.constant 0 : index
      %90 = vector.load %arg19[%89, %c0_50, %c0_51] : memref<4x64x32xbf16, #tpu.memory_space<vmem>>, vector<1x64x32xbf16>
      %91 = vector.shape_cast %90 : vector<1x64x32xbf16> to vector<64x32xbf16>
      %cst_52 = arith.constant dense<0.000000e+00> : vector<32x64xf32>
      %92 = tpu.matmul %88, %91, %cst_52 {dimension_numbers = #tpu.dot_dimension_numbers<[1], [1], [0], [0], [0, 0, 1, 0], [], []>} : vector<32x32xbf16>, vector<64x32xbf16>, vector<32x64xf32> -> vector<32x64xf32>
      %cst_53 = arith.constant dense<0xFF800000> : vector<32xf32>
      %93 = vector.multi_reduction <maximumf>, %92, %cst_53 [1] : vector<32x64xf32> to vector<32xf32>
      %94 = vector.shape_cast %93 : vector<32xf32> to vector<32x1xf32>
      %95 = vector.broadcast %94 : vector<32x1xf32> to vector<32x64xf32>
      %96 = arith.subf %92, %95 : vector<32x64xf32>
      %97 = math.exp %96 : vector<32x64xf32>
      %cst_54 = arith.constant dense<0.000000e+00> : vector<32xf32>
      %98 = vector.multi_reduction <add>, %97, %cst_54 [1] : vector<32x64xf32> to vector<32xf32>
      %99 = vector.shape_cast %98 : vector<32xf32> to vector<32x1xf32>
      %100 = tpu.reciprocal %99 : vector<32x1xf32> -> vector<32x1xf32>
      %101 = vector.broadcast %100 : vector<32x1xf32> to vector<32x64xf32>
      %102 = arith.mulf %97, %101 : vector<32x64xf32>
      %103 = arith.truncf %102 : vector<32x64xf32> to vector<32x64xbf16>
      %104 = arith.index_cast %84 : i32 to index
      %c0_55 = arith.constant 0 : index
      %c0_56 = arith.constant 0 : index
      %105 = vector.load %arg20[%104, %c0_55, %c0_56] : memref<4x64x32xbf16, #tpu.memory_space<vmem>>, vector<1x64x32xbf16>
      %106 = vector.shape_cast %105 : vector<1x64x32xbf16> to vector<64x32xbf16>
      %cst_57 = arith.constant dense<0.000000e+00> : vector<32x32xf32>
      %107 = tpu.matmul %103, %106, %cst_57 {dimension_numbers = #tpu.dot_dimension_numbers<[1], [0], [0], [1], [0, 0, 1, 1], [], []>} : vector<32x64xbf16>, vector<64x32xbf16>, vector<32x32xf32> -> vector<32x32xf32>
      %108 = arith.truncf %107 : vector<32x32xf32> to vector<32x32xbf16>
      %109 = arith.index_cast %84 : i32 to index
      %c0_58 = arith.constant 0 : index
      %c0_59 = arith.constant 0 : index
      %110 = vector.load %arg21[%109, %c0_58, %c0_59] : memref<4x32x32xbf16, #tpu.memory_space<vmem>>, vector<1x32x32xbf16>
      %111 = vector.shape_cast %110 : vector<1x32x32xbf16> to vector<32x32xbf16>
      %112 = vector.shape_cast %108 : vector<32x32xbf16> to vector<1x32x32xbf16>
      tpu.vector_store %arg21[%109, %c0_58, %c0_59], %112 {strides = array<i32>} : memref<4x32x32xbf16, #tpu.memory_space<vmem>>, vector<1x32x32xbf16>,
    }
    %c4_i32_3 = arith.constant 4 : i32
    %c0_4 = arith.constant 0 : index
    %c0_5 = arith.constant 0 : index
    %c0_6 = arith.constant 0 : index
    %9 = vector.load %arg21[%c0_4, %c0_5, %c0_6] : memref<4x32x32xbf16, #tpu.memory_space<vmem>>, vector<1x32x32xbf16>
    %10 = vector.shape_cast %9 : vector<1x32x32xbf16> to vector<32x32xbf16>
    %c1 = arith.constant 1 : index
    %c0_7 = arith.constant 0 : index
    %c0_8 = arith.constant 0 : index
    %11 = vector.load %arg21[%c1, %c0_7, %c0_8] : memref<4x32x32xbf16, #tpu.memory_space<vmem>>, vector<1x32x32xbf16>
    %12 = vector.shape_cast %11 : vector<1x32x32xbf16> to vector<32x32xbf16>
    %c2 = arith.constant 2 : index
    %c0_9 = arith.constant 0 : index
    %c0_10 = arith.constant 0 : index
    %13 = vector.load %arg21[%c2, %c0_9, %c0_10] : memref<4x32x32xbf16, #tpu.memory_space<vmem>>, vector<1x32x32xbf16>
    %14 = vector.shape_cast %13 : vector<1x32x32xbf16> to vector<32x32xbf16>
    %c3 = arith.constant 3 : index
    %c0_11 = arith.constant 0 : index
    %c0_12 = arith.constant 0 : index
    %15 = vector.load %arg21[%c3, %c0_11, %c0_12] : memref<4x32x32xbf16, #tpu.memory_space<vmem>>, vector<1x32x32xbf16>
    %16 = vector.shape_cast %15 : vector<1x32x32xbf16> to vector<32x32xbf16>
    %17 = tpu.concatenate %10, %12, %14, %16 in 1 : vector<32x32xbf16>, vector<32x32xbf16>, vector<32x32xbf16>, vector<32x32xbf16> -> vector<32x128xbf16>
    %c0_13 = arith.constant 0 : index
    %c0_14 = arith.constant 0 : index
    %18 = vector.load %arg7[%c0_13, %c0_14] : memref<128x128xbf16, #tpu.memory_space<vmem>>, vector<128x128xbf16>
    %cst = arith.constant dense<0.000000e+00> : vector<32x128xf32>
    %19 = tpu.matmul %17, %18, %cst {dimension_numbers = #tpu.dot_dimension_numbers<[1], [0], [0], [1], [0, 0, 1, 1], [], []>} : vector<32x128xbf16>, vector<128x128xbf16>, vector<32x128xf32> -> vector<32x128xf32>
    %c0_15 = arith.constant 0 : index
    %c0_16 = arith.constant 0 : index
    %20 = vector.load %arg8[%c0_15, %c0_16] : memref<1x128xf32, #tpu.memory_space<vmem>>, vector<1x128xf32>
    %21 = vector.broadcast %20 : vector<1x128xf32> to vector<32x128xf32>
    %22 = arith.addf %19, %21 : vector<32x128xf32>
    %c0_17 = arith.constant 0 : index
    %c0_18 = arith.constant 0 : index
    %23 = vector.load %arg9[%c0_17, %c0_18] : memref<1x128xf32, #tpu.memory_space<vmem>>, vector<1x128xf32>
    %24 = vector.broadcast %23 : vector<1x128xf32> to vector<32x128xf32>
    %25 = arith.mulf %24, %22 : vector<32x128xf32>
    %26 = arith.addf %7, %25 : vector<32x128xf32>
    %c0_19 = arith.constant 0 : index
    %c0_20 = arith.constant 0 : index
    %27 = vector.load %arg10[%c0_19, %c0_20] : memref<1x128xf32, #tpu.memory_space<vmem>>, vector<1x128xf32>
    %c0_21 = arith.constant 0 : index
    %c0_22 = arith.constant 0 : index
    %28 = vector.load %arg11[%c0_21, %c0_22] : memref<1x128xf32, #tpu.memory_space<vmem>>, vector<1x128xf32>
    %cst_23 = arith.constant dense<0.000000e+00> : vector<32xf32>
    %29 = vector.multi_reduction <add>, %26, %cst_23 [1] : vector<32x128xf32> to vector<32xf32>
    %30 = vector.shape_cast %29 : vector<32xf32> to vector<32x1xf32>
    %cst_24 = arith.constant 1.280000e+02 : f32
    %31 = vector.broadcast %cst_24 : f32 to vector<32x1xf32>
    %32 = arith.divf %30, %31 : vector<32x1xf32>
    %33 = vector.broadcast %32 : vector<32x1xf32> to vector<32x128xf32>
    %34 = arith.subf %26, %33 : vector<32x128xf32>
    %35 = arith.mulf %34, %34 : vector<32x128xf32>
    %cst_25 = arith.constant dense<0.000000e+00> : vector<32xf32>
    %36 = vector.multi_reduction <add>, %35, %cst_25 [1] : vector<32x128xf32> to vector<32xf32>
    %37 = vector.shape_cast %36 : vector<32xf32> to vector<32x1xf32>
    %cst_26 = arith.constant 1.280000e+02 : f32
    %38 = vector.broadcast %cst_26 : f32 to vector<32x1xf32>
    %39 = arith.divf %37, %38 : vector<32x1xf32>
    %40 = vector.broadcast %32 : vector<32x1xf32> to vector<32x128xf32>
    %41 = arith.subf %26, %40 : vector<32x128xf32>
    %cst_27 = arith.constant 9.99999974E-6 : f32
    %42 = vector.broadcast %cst_27 : f32 to vector<32x1xf32>
    %43 = arith.addf %39, %42 : vector<32x1xf32>
    %44 = math.rsqrt %43 : vector<32x1xf32>
    %45 = vector.broadcast %44 : vector<32x1xf32> to vector<32x128xf32>
    %46 = arith.mulf %41, %45 : vector<32x128xf32>
    %47 = vector.broadcast %27 : vector<1x128xf32> to vector<32x128xf32>
    %48 = arith.mulf %46, %47 : vector<32x128xf32>
    %49 = vector.broadcast %28 : vector<1x128xf32> to vector<32x128xf32>
    %50 = arith.addf %48, %49 : vector<32x128xf32>
    %51 = arith.truncf %50 : vector<32x128xf32> to vector<32x128xbf16>
    %c0_28 = arith.constant 0 : index
    %c0_29 = arith.constant 0 : index
    %52 = vector.load %arg12[%c0_28, %c0_29] : memref<128x512xbf16, #tpu.memory_space<vmem>>, vector<128x512xbf16>
    %cst_30 = arith.constant dense<0.000000e+00> : vector<32x512xf32>
    %53 = tpu.matmul %51, %52, %cst_30 {dimension_numbers = #tpu.dot_dimension_numbers<[1], [0], [0], [1], [0, 0, 1, 1], [], []>} : vector<32x128xbf16>, vector<128x512xbf16>, vector<32x512xf32> -> vector<32x512xf32>
    %c0_31 = arith.constant 0 : index
    %c0_32 = arith.constant 0 : index
    %54 = vector.load %arg13[%c0_31, %c0_32] : memref<1x512xf32, #tpu.memory_space<vmem>>, vector<1x512xf32>
    %55 = vector.broadcast %54 : vector<1x512xf32> to vector<32x512xf32>
    %56 = arith.addf %53, %55 : vector<32x512xf32>
    %57 = arith.truncf %56 : vector<32x512xf32> to vector<32x512xbf16>
    %58 = arith.mulf %57, %57 : vector<32x512xbf16>
    %59 = arith.mulf %57, %58 : vector<32x512xbf16>
    %cst_33 = arith.constant 4.467770e-02 : bf16
    %60 = vector.broadcast %cst_33 : bf16 to vector<32x512xbf16>
    %61 = arith.mulf %60, %59 : vector<32x512xbf16>
    %62 = arith.addf %57, %61 : vector<32x512xbf16>
    %cst_34 = arith.constant 7.968750e-01 : bf16
    %63 = vector.broadcast %cst_34 : bf16 to vector<32x512xbf16>
    %64 = arith.mulf %63, %62 : vector<32x512xbf16>
    %65 = math.tanh %64 : vector<32x512xbf16>
    %cst_35 = arith.constant 1.000000e+00 : bf16
    %66 = vector.broadcast %cst_35 : bf16 to vector<32x512xbf16>
    %67 = arith.addf %66, %65 : vector<32x512xbf16>
    %cst_36 = arith.constant 5.000000e-01 : bf16
    %68 = vector.broadcast %cst_36 : bf16 to vector<32x512xbf16>
    %69 = arith.mulf %68, %67 : vector<32x512xbf16>
    %70 = arith.mulf %57, %69 : vector<32x512xbf16>
    %c0_37 = arith.constant 0 : index
    %c0_38 = arith.constant 0 : index
    %71 = vector.load %arg14[%c0_37, %c0_38] : memref<512x128xbf16, #tpu.memory_space<vmem>>, vector<512x128xbf16>
    %cst_39 = arith.constant dense<0.000000e+00> : vector<32x128xf32>
    %72 = tpu.matmul %70, %71, %cst_39 {dimension_numbers = #tpu.dot_dimension_numbers<[1], [0], [0], [1], [0, 0, 1, 1], [], []>} : vector<32x512xbf16>, vector<512x128xbf16>, vector<32x128xf32> -> vector<32x128xf32>
    %c0_40 = arith.constant 0 : index
    %c0_41 = arith.constant 0 : index
    %73 = vector.load %arg15[%c0_40, %c0_41] : memref<1x128xf32, #tpu.memory_space<vmem>>, vector<1x128xf32>
    %74 = vector.broadcast %73 : vector<1x128xf32> to vector<32x128xf32>
    %75 = arith.addf %72, %74 : vector<32x128xf32>
    %c0_42 = arith.constant 0 : index
    %c0_43 = arith.constant 0 : index
    %76 = vector.load %arg16[%c0_42, %c0_43] : memref<1x128xf32, #tpu.memory_space<vmem>>, vector<1x128xf32>
    %77 = vector.broadcast %76 : vector<1x128xf32> to vector<32x128xf32>
    %78 = arith.mulf %77, %75 : vector<32x128xf32>
    %79 = arith.addf %26, %78 : vector<32x128xf32>
    %c0_44 = arith.constant 0 : index
    %c0_45 = arith.constant 0 : index
    %c0_46 = arith.constant 0 : index
    %80 = vector.load %arg17[%c0_44, %c0_45, %c0_46] : memref<1x32x128xf32, #tpu.memory_space<vmem>>, vector<1x32x128xf32>
    %81 = vector.shape_cast %80 : vector<1x32x128xf32> to vector<32x128xf32>
    %82 = vector.shape_cast %79 : vector<32x128xf32> to vector<1x32x128xf32>
    tpu.vector_store %arg17[%c0_44, %c0_45, %c0_46], %82 {strides = array<i32>} : memref<1x32x128xf32, #tpu.memory_space<vmem>>, vector<1x32x128xf32>,
    return
  }
  func.func @transform_0(%arg0: i32, %arg1: i32) -> (i32, i32, i32) {
    %c0_i32 = arith.constant 0 : i32
    %c0_i32_0 = arith.constant 0 : i32
    %c0_i32_1 = arith.constant 0 : i32
    return %arg0, %c0_i32, %c0_i32_0 : i32, i32, i32
  }
  func.func @transform_1(%arg0: i32, %arg1: i32) -> (i32, i32) {
    %c0_i32 = arith.constant 0 : i32
    %c0_i32_0 = arith.constant 0 : i32
    %c0_i32_1 = arith.constant 0 : i32
    return %c0_i32, %c0_i32_0 : i32, i32
  }
  func.func @transform_2(%arg0: i32, %arg1: i32) -> (i32, i32) {
    %c0_i32 = arith.constant 0 : i32
    %c0_i32_0 = arith.constant 0 : i32
    %c0_i32_1 = arith.constant 0 : i32
    return %c0_i32, %c0_i32_0 : i32, i32
  }
  func.func @transform_3(%arg0: i32, %arg1: i32) -> (i32, i32) {
    %c0_i32 = arith.constant 0 : i32
    %c0_i32_0 = arith.constant 0 : i32
    %c0_i32_1 = arith.constant 0 : i32
    return %c0_i32, %c0_i32_0 : i32, i32
  }
  func.func @transform_4(%arg0: i32, %arg1: i32) -> (i32, i32) {
    %c0_i32 = arith.constant 0 : i32
    %c0_i32_0 = arith.constant 0 : i32
    %c0_i32_1 = arith.constant 0 : i32
    return %c0_i32, %c0_i32_0 : i32, i32
  }
  func.func @transform_5(%arg0: i32, %arg1: i32) -> (i32, i32) {
    %c0_i32 = arith.constant 0 : i32
    %c0_i32_0 = arith.constant 0 : i32
    %c0_i32_1 = arith.constant 0 : i32
    return %c0_i32, %c0_i32_0 : i32, i32
  }
  func.func @transform_6(%arg0: i32, %arg1: i32) -> (i32, i32) {
    %c0_i32 = arith.constant 0 : i32
    %c0_i32_0 = arith.constant 0 : i32
    %c0_i32_1 = arith.constant 0 : i32
    return %c0_i32, %c0_i32_0 : i32, i32
  }
  func.func @transform_7(%arg0: i32, %arg1: i32) -> (i32, i32) {
    %c0_i32 = arith.constant 0 : i32
    %c0_i32_0 = arith.constant 0 : i32
    %c0_i32_1 = arith.constant 0 : i32
    return %c0_i32, %c0_i32_0 : i32, i32
  }
  func.func @transform_8(%arg0: i32, %arg1: i32) -> (i32, i32) {
    %c0_i32 = arith.constant 0 : i32
    %c0_i32_0 = arith.constant 0 : i32
    %c0_i32_1 = arith.constant 0 : i32
    return %c0_i32, %c0_i32_0 : i32, i32
  }
  func.func @transform_9(%arg0: i32, %arg1: i32) -> (i32, i32) {
    %c0_i32 = arith.constant 0 : i32
    %c0_i32_0 = arith.constant 0 : i32
    %c0_i32_1 = arith.constant 0 : i32
    return %c0_i32, %c0_i32_0 : i32, i32
  }
  func.func @transform_10(%arg0: i32, %arg1: i32) -> (i32, i32) {
    %c0_i32 = arith.constant 0 : i32
    %c0_i32_0 = arith.constant 0 : i32
    %c0_i32_1 = arith.constant 0 : i32
    return %c0_i32, %c0_i32_0 : i32, i32
  }
  func.func @transform_11(%arg0: i32, %arg1: i32) -> (i32, i32) {
    %c0_i32 = arith.constant 0 : i32
    %c0_i32_0 = arith.constant 0 : i32
    %c0_i32_1 = arith.constant 0 : i32
    return %c0_i32, %c0_i32_0 : i32, i32
  }
  func.func @transform_12(%arg0: i32, %arg1: i32) -> (i32, i32) {
    %c0_i32 = arith.constant 0 : i32
    %c0_i32_0 = arith.constant 0 : i32
    %c0_i32_1 = arith.constant 0 : i32
    return %c0_i32, %c0_i32_0 : i32, i32
  }
  func.func @transform_13(%arg0: i32, %arg1: i32) -> (i32, i32) {
    %c0_i32 = arith.constant 0 : i32
    %c0_i32_0 = arith.constant 0 : i32
    %c0_i32_1 = arith.constant 0 : i32
    return %c0_i32, %c0_i32_0 : i32, i32
  }
  func.func @transform_14(%arg0: i32, %arg1: i32) -> (i32, i32) {
    %c0_i32 = arith.constant 0 : i32
    %c0_i32_0 = arith.constant 0 : i32
    %c0_i32_1 = arith.constant 0 : i32
    return %c0_i32, %c0_i32_0 : i32, i32
  }
  func.func @transform_15(%arg0: i32, %arg1: i32) -> (i32, i32, i32) {
    %c0_i32 = arith.constant 0 : i32
    %c0_i32_0 = arith.constant 0 : i32
    return %arg0, %arg1, %c0_i32 : i32, i32, i32
  }
}

</mosaic_0001>

<bundles_post_ra>
// kernel: tpu_custom_call.1
= control target key start
LH: loop header
LB: loop body
LE: loop exit
PB: predicated region body
PF: predicated region fallthrough
CT: control target
= control target key end

     0   :  { %s5166_s0 = inlined_call_operand.hbm [shape: f32[2,64,128], index: 0, kind: input, shape index: {}]   ;;  %s5167_s1 = inlined_call_operand.hbm [shape: f32[1,128], index: 1, kind: input, shape index: {}]   ;;  %s5168_s2 = inlined_call_operand.hbm [shape: f32[1,128], index: 2, kind: input, shape index: {}]   ;;  %s5169_s3 = inlined_call_operand.hbm [shape: bf16[128,384], index: 3, kind: input, shape index: {}]   ;;  %s5170_s4 = inlined_call_operand.vmem [shape: f32[1,384], index: 4, kind: input, shape index: {}]   ;;  %s5171_s5 = inlined_call_operand.hbm [shape: bf16[128,128], index: 5, kind: input, shape index: {}]   ;;  %s5172_s6 = inlined_call_operand.vmem [shape: f32[1,128], index: 6, kind: input, shape index: {}]   ;;  %s5173_s7 = inlined_call_operand.vmem [shape: f32[1,128], index: 7, kind: input, shape index: {}]   ;;  %s5174_s8 = inlined_call_operand.vmem [shape: f32[1,128], index: 8, kind: input, shape index: {}]   ;;  %s5175_s9 = inlined_call_operand.vmem [shape: f32[1,128], index: 9, kind: input, shape index: {}]   ;;  %s5176_s10 = inlined_call_operand.hbm [shape: bf16[128,512], index: 10, kind: input, shape index: {}]   ;;  %s5177_s11 = inlined_call_operand.vmem [shape: f32[1,512], index: 11, kind: input, shape index: {}]   ;;  %s5178_s12 = inlined_call_operand.hbm [shape: bf16[512,128], index: 12, kind: input, shape index: {}]   ;;  %s5179_s13 = inlined_call_operand.vmem [shape: f32[1,128], index: 13, kind: input, shape index: {}]   ;;  %s5180_s14 = inlined_call_operand.vmem [shape: f32[1,128], index: 14, kind: input, shape index: {}]   ;;  %s5181_s15 = inlined_call_operand.hbm [shape: f32[2,64,128], index: 15, kind: output, shape index: {}]  }
   0x1   :  { %5188 = sst [smem:[#allocation27_spill]] %s5167_s1 }
   0x2   :  { %5189 = sst [smem:[#allocation28_spill]] %s5168_s2 }
   0x3   :  { %5190 = sst [smem:[#allocation29_spill]] %s5169_s3 }
   0x4   :  { %5191 = sst [smem:[#allocation30_spill]] %s5170_s4 }
   0x5   :  { %5192 = sst [smem:[#allocation31_spill]] %s5171_s5 }
   0x6   :  { %5193 = sst [smem:[#allocation32_spill]] %s5172_s6 }
   0x7   :  { %5194 = sst [smem:[#allocation33_spill]] %s5173_s7 }
   0x8   :  { %5195 = sst [smem:[#allocation34_spill]] %s5174_s8 }
   0x9   :  { %5196 = sst [smem:[#allocation35_spill]] %s5175_s9 }
   0xa   :  { %5197 = sst [smem:[#allocation36_spill]] %s5176_s10 }
   0xb   :  { %5198 = sst [smem:[#allocation37_spill]] %s5177_s11 }
   0xc   :  { %5199 = sst [smem:[#allocation38_spill]] %s5178_s12 }
   0xd   :  { %5200 = sst [smem:[#allocation39_spill]] %s5179_s13 }
   0xe   :  { %5201 = sst [smem:[#allocation40_spill]] %s5180_s14 }
   0xf   :  { %5202 = sst [smem:[#allocation41_spill]] %s5181_s15 }
  0x10   :  { %20 = vsyncpa [#allocation7], 0 }
  0x11   :  { %22 = vsyncpa [#allocation7 + $0x1], 0 }
  0x12   :  { %23 = vsyncpa [#allocation10], 0 }
  0x13   :  { %24 = vsyncpa [#allocation13], 0 }
  0x14   :  { %25 = vsyncpa [#allocation16], 0 }
  0x15   :  { %26 = vsyncpa [#allocation8], 0 }
  0x16   :  { %28 = vsyncpa [#allocation8 + $0x1], 0  ;;  %s4240_s18 = smov 0   ;;  %s4242_s19 = smov 0  }
  0x17   :  { %s4244_s20 = smov 0   ;;  %s4246_s21 = smov 0  }
  0x18   :  { %s4248_s22 = smov 0   ;;  %s4250_s23 = smov 0  }
  0x19   :  { %s4252_s24 = smov 0   ;;  %s4254_s25 = smov 0  }
  0x1a   :  { %s4256_s26 = smov 0   ;;  %s4258_s27 = smov 0  }
  0x1b   :  { %s4260_s28 = smov 0  }
  0x1c LB: > { %5203 = sst [smem:[#allocation24_spill]] %s4112_s24  ;;  %s3025_s29 = sadd.s32 4294967295, %s4128_s28   ;;  %s4128_s28 = sphi %s4260_s28, %s34_s28   ;;  %s4124_s27 = sphi %s4258_s27, %s5250_s27   ;;  %s4120_s26 = sphi %s4256_s26, %s5249_s26   ;;  %s4116_s25 = sphi %s4254_s25, %s5248_s25   ;;  %s4112_s24 = sphi %s4252_s24, %s5247_s24   ;;  %s4108_s23 = sphi %s4250_s23, %s5246_s23   ;;  %s4104_s22 = sphi %s4248_s22, %s5245_s22   ;;  %s4100_s21 = sphi %s4246_s21, %s5244_s21   ;;  %s4096_s20 = sphi %s4244_s20, %s5243_s20   ;;  %s4092_s19 = sphi %s4242_s19, %s5242_s19   ;;  %s4088_s18 = sphi %s4240_s18, %s5241_s18  }
  0x1d   : > { %5204 = sst [smem:[#allocation25_spill]] %s4116_s25  ;;  %p3027_p0 = scmp.ge.s32.totalorder %s4128_s28, 1 }
  0x1e   : > { %p4297_p1 = scmp.eq.s32.totalorder %s3025_s29, 0  ;;  %p4301_p2 = scmp.eq.s32.totalorder %s3025_s29, 3 }
  0x1f   : > { %p399_p3 = scmp.lt.s32.totalorder %s4128_s28, 5  ;;  %s4134_s15 = smov [#allocation9]  }
  0x20   : > { %s5205_s30 = scalar_select %p4297_p1, 1, 0 }
  0x21   : > { %s5206_s16 = scalar_select %p4301_p2, 1, 0 }
  0x22   : > { %p4306_p4 = pnand %p3027_p0, %p399_p3  ;;  %s412_s25 = sshll.u32 %s4134_s15, 4  ;;  %s413_s25 = int_to_ptr.vmem [resolvable:$true] %s412_s25 }
  0x23   : > { %s4135_s14 = smov [#allocation12]   ;;  %s4136_s11 = smov [#allocation15]  }
  0x24   : > { %s5207_s17 = scalar_select %p4306_p4, 1, 0 }
  0x25   : > { %p3453_p5 = pneg %p4306_p4  ;;  %s433_s13 = sshll.u32 %s4135_s14, 4  ;;  %s4312_s13 = int_to_ptr.vmem [resolvable:$true] %s433_s13 }
  0x26   : > { %s474_s9 = sshll.u32 %s4136_s11, 4  ;;  %s3819_s15 = scalar_lea.vmem %s413_s25, 16  ;;  %s475_s9 = int_to_ptr.vmem [resolvable:$true] %s474_s9 }
  0x27   : > { %p4316_p6 = pnand %p3453_p5, %p4297_p1  ;;  %p3820_p8 = scmp.ne.s32.totalorder %s413_s25, %s3819_s15 }
  0x28   : > { %s3826_s14 = scalar_lea.vmem %s413_s25, 32  ;;  %p3827_p11 = scmp.lt.s32.totalorder %s413_s25, %s413_s25 }
  0x29   : > { %p4322_p7 = pneg %p4316_p6  ;;  %p3828_p12 = scmp.lt.s32.totalorder %s3826_s14, %s3819_s15 }
  0x2b   : > { %p3822_p9 = pnand %p3820_p8, %p4322_p7  ;;  %p3829_p13 = por %p3828_p12, %p3827_p11 }
  0x2d   : > { %p3823_p10 = pneg %p3822_p9 }
  0x2f   : > { %p3830_p0 = pnand %p3829_p13, %p3823_p10 }
  0x31   : > { %3833 = shalt.err (!%p3830_p0)
}
  0x32   : > { %s5210_s1 = sld [smem:[#allocation27_spill]]  ;;  %s3845_s6 = scalar_lea.vmem %s4312_s13, 3072 }
  0x33   : > { %p3846_p3 = scmp.ne.s32.totalorder %s4312_s13, %s3845_s6  ;;  %p3853_p9 = scmp.lt.s32.totalorder %s4312_s13, %s4312_s13 }
  0x34   : > { %p3854_p11 = scmp.lt.s32.totalorder %s3845_s6, %s3845_s6 }
  0x35   : > { %p3848_p5 = pnand %p3846_p3, %p4322_p7 }
  0x36   : > { %p3855_p10 = por %p3854_p11, %p3853_p9 }
  0x37   : > { %p3849_p8 = pneg %p3848_p5 }
  0x38   : > { %3456 = dma.hbm_to_vmem [thread:$0]  (!%p4316_p6), %s5210_s1, 16, %s413_s25, [#allocation10]  }
  0x39   : > { %p3856_p12 = pnand %p3855_p10, %p3849_p8 }
  0x3b   : > { %3859 = shalt.err (!%p3856_p12)
}
  0x3c   : > { %s4137_s15 = smov 192   ;;  %s4138_s7 = smov 12  }
  0x3d   : > { %s5211_s3 = sld [smem:[#allocation29_spill]]  ;;  %s3871_s25 = scalar_lea.vmem %s475_s9, 4096 }
  0x3e   : > { %p3872_p13 = scmp.ne.s32.totalorder %s475_s9, %s3871_s25  ;;  %p3879_p5 = scmp.lt.s32.totalorder %s475_s9, %s475_s9 }
  0x3f   : > { %p3880_p9 = scmp.lt.s32.totalorder %s3871_s25, %s3871_s25 }
  0x40   : > { %p3874_p0 = pnand %p3872_p13, %p4322_p7 }
  0x41   : > { %p3881_p8 = por %p3880_p9, %p3879_p5 }
  0x42   : > { %p3875_p3 = pneg %p3874_p0 }
  0x43   : > { %3462 = dma.hbm_to_vmem [thread:$0]  (!%p4316_p6), %s5211_s3, 3072, %s4312_s13, [#allocation13], %s4137_s15, %s4137_s15, %s4138_s7  }
  0x44   : > { %p3882_p11 = pnand %p3881_p8, %p3875_p3 }
  0x46   : > { %3885 = shalt.err (!%p3882_p11)
}
  0x47   : > { %s4139_s6 = smov 256   ;;  %s4140_s1 = smov 16  }
  0x48   : > { %s5212_s10 = sld [smem:[#allocation36_spill]]  ;;  %s4141_s13 = smov [#allocation11]  }
  0x49   : > { %s423_s15 = sshll.u32 %s4141_s13, 4  ;;  %s4142_s7 = smov [#allocation14]   ;;  %s424_s15 = int_to_ptr.vmem [resolvable:$true] %s423_s15 }
  0x4a   : > { %s449_s14 = sshll.u32 %s4142_s7, 4  ;;  %s3897_s11 = scalar_lea.vmem %s424_s15, 16  ;;  %s450_s14 = int_to_ptr.vmem [resolvable:$true] %s449_s14 }
  0x4b   : > { %p3898_p10 = scmp.ne.s32.totalorder %s424_s15, %s3897_s11  ;;  %s3904_s25 = scalar_lea.vmem %s424_s15, 32 }
  0x4c   : > { %p3905_p0 = scmp.lt.s32.totalorder %s424_s15, %s424_s15  ;;  %p3906_p3 = scmp.lt.s32.totalorder %s3904_s25, %s3897_s11 }
  0x4d   : > { %p3900_p12 = pnand %p3898_p10, %p4322_p7 }
  0x4e   : > { %3468 = dma.hbm_to_vmem [thread:$0]  (!%p4316_p6), %s5212_s10, 4096, %s475_s9, [#allocation16], %s4139_s6, %s4139_s6, %s4140_s1  }
  0x4f   : > { %p3901_p13 = pneg %p3900_p12  ;;  %p3907_p5 = por %p3906_p3, %p3905_p0 }
  0x51   : > { %p3908_p9 = pnand %p3907_p5, %p3901_p13 }
  0x53   : > { %3911 = shalt.err (!%p3908_p9)
}
  0x54   : > { %s5213_s2 = sld [smem:[#allocation28_spill]]  ;;  %s3923_s9 = scalar_lea.vmem %s450_s14, 1024 }
  0x55   : > { %p3924_p8 = scmp.ne.s32.totalorder %s450_s14, %s3923_s9  ;;  %p3931_p10 = scmp.lt.s32.totalorder %s450_s14, %s450_s14 }
  0x56   : > { %p3932_p12 = scmp.lt.s32.totalorder %s3923_s9, %s3923_s9 }
  0x57   : > { %p3926_p11 = pnand %p3924_p8, %p4322_p7 }
  0x58   : > { %p3933_p2 = por %p3932_p12, %p3931_p10 }
  0x59   : > { %p3927_p4 = pneg %p3926_p11 }
  0x5a   : > { %3459 = dma.hbm_to_vmem [thread:$0]  (!%p4316_p6), %s5213_s2, 16, %s424_s15, [#allocation10]  }
  0x5b   : > { %p3934_p1 = pnand %p3933_p2, %p3927_p4 }
  0x5d   : > { %3937 = shalt.err (!%p3934_p1)
}
  0x5e   : > { %s4143_s24 = smov 64   ;;  %s4144_s6 = smov 4  }
  0x5f   : > { %s5214_s5 = sld [smem:[#allocation31_spill]]  ;;  %s4145_s15 = smov [#allocation17]  }
  0x60   : > { %s490_s11 = sshll.u32 %s4145_s15, 4  ;;  %s491_s11 = int_to_ptr.vmem [resolvable:$true] %s490_s11 }
  0x61   : > { %s3949_s25 = scalar_lea.vmem %s491_s11, 4096  ;;  %p3957_p5 = scmp.lt.s32.totalorder %s491_s11, %s491_s11 }
  0x62   : > { %p3950_p13 = scmp.ne.s32.totalorder %s491_s11, %s3949_s25  ;;  %p3958_p2 = scmp.lt.s32.totalorder %s3949_s25, %s3949_s25 }
  0x64   : > { %p3952_p0 = pnand %p3950_p13, %p4322_p7  ;;  %p3959_p1 = por %p3958_p2, %p3957_p5 }
  0x65   : > { %3465 = dma.hbm_to_vmem [thread:$0]  (!%p4316_p6), %s5214_s5, 1024, %s450_s14, [#allocation13], %s4143_s24, %s4143_s24, %s4144_s6  }
  0x66   : > { %p3953_p3 = pneg %p3952_p0 }
  0x68   : > { %p3960_p4 = pnand %p3959_p1, %p3953_p3 }
  0x6a   : > { %3963 = shalt.err (!%p3960_p4)
}
  0x6b   : > { %s5215_s12 = sld [smem:[#allocation38_spill]]  ;;  %s3026_s8 = sadd.s32 4294967294, %s4128_s28  }
  0x6c   : > { %s43_s29 = sadd.s32 1, %s4120_s26  ;;  %s46_s14 = sadd.s32 1, %s4124_s27 }
  0x6d   : > { %p44_p7 = scmp.ge.s32.totalorder %s43_s29, 2  ;;  %s53_s9 = sadd.s32 1, %s4108_s23 }
  0x6e   : > { %p60_p9 = scmp.ne.s32.totalorder %s4108_s23, %s4104_s22  ;;  %p61_p8 = scmp.eq.s32.totalorder %s4128_s28, 0 }
  0x6f   : > { %s5252_s29 = smov (%p44_p7, %s43_s29), 0  ;;  %s5254_s14 = smov (!%p44_p7, %s46_s14), %s4124_s27 }
  0x70   : > { %p4383_p11 = por %p61_p8, %p60_p9  ;;  %p48_p10 = scmp.ge.s32.totalorder %s5254_s14, 2 }
  0x71   : > { %3471 = dma.hbm_to_vmem [thread:$0]  (!%p4316_p6), %s5215_s12, 4096, %s491_s11, [#allocation16], %s4143_s24, %s4143_s24, %s4144_s6  }
  0x72   : > { %p66_p6 = scmp.ne.s32.totalorder %s4104_s22, %s4100_s21  ;;  %s371_s6 = ssub.s32 %s4120_s26, %s5252_s29 }
  0x73   : > { %p5217_p12 = scmp.ne.s32.totalorder %s5205_s30, 0  ;;  %s375_s7 = sadd.s32 1, %s4096_s20 }
  0x74   : > { %s5256_s14 = smov (%p48_p10, %s5254_s14), 0  ;;  %p385_p0 = scmp.ne.s32.totalorder %s4096_s20, %s4092_s19 }
  0x75   : > { %p4393_p13 = por %p5217_p12, %p66_p6  ;;  %5219 = sst [smem:[#allocation26_spill]] %s5256_s14 }
  0x76   : > { %p391_p3 = scmp.ne.s32.totalorder %s4092_s19, %s4088_s18  ;;  %s50_s15 = ssub.s32 %s4124_s27, %s5256_s14 }
  0x77   : > { %p392_p5 = scmp.eq.s32.totalorder %s3026_s8, 3  ;;  %p51_p2 = scmp.eq.s32.totalorder %s50_s15, 0 }
  0x78   : > { %s372_s21 = sor.u32 %s371_s6, %s50_s15  ;;  %p5220_p4 = scmp.ne.s32.totalorder %s5206_s16, 0 }
  0x79   : > { %p373_p1 = scmp.eq.s32.totalorder %s372_s21, 0  ;;  %p4418_p9 = por %p392_p5, %p391_p3 }
  0x7a   : > { %p4408_p7 = por %p5220_p4, %p385_p0  ;;  %p3486_p8 = scmp.lt.s32.totalorder %s4128_s28, 4 }
  0x7b   : > { %s4413_s25 = scalar_select %p51_p2, %s4108_s23, %s53_s9  }
  0x7c   : > { %s4416_s1 = scalar_select %p373_p1, %s4096_s20, %s375_s7  }
  0x7d   : > { %s510_s2 = sand.u32 1, %s4108_s23   ;;  %s3215_s3 = sshll.u32 %s4124_s27, 10 }
  0x7e   : > { %s3035_s8 = sshll.u32 %s510_s2, 6  ;;  %s520_s16 = scalar_lea.hbm %s5166_s0, %s3215_s3 }
  0x7f   : > { %s514_s15 = scalar_lea.vmem [#allocation6], %s3035_s8  ;;  %p4430_p6 = pnand %p3486_p8, %p4383_p11 }
  0x80   : > { %s521_s21 = sshll.u32 %s514_s15, 4  ;;  %s511_s7 = scalar_lea.sflag [#allocation7], %s510_s2  ;;  %s522_s21 = int_to_ptr.vmem [resolvable:$true] %s521_s21 }
  0x81   : > { %p3966_p10 = pneg %p4430_p6  ;;  %s3977_s10 = scalar_lea.vmem %s522_s21, 1024 }
  0x82   : > { %p3978_p12 = scmp.ne.s32.totalorder %s522_s21, %s3977_s10  ;;  %s4146_s12 = smov [#allocation6]  }
  0x83   : > { %s3982_s14 = sshll.u32 %s4146_s12, 4  ;;  %s3983_s14 = int_to_ptr.vmem [resolvable:$false] %s3982_s14 }
  0x84   : > { %p3980_p0 = pnand %p3978_p12, %p3966_p10  ;;  %s3984_s3 = scalar_lea.vmem %s3983_s14, 2048 }
  0x85   : > { %p3985_p5 = scmp.lt.s32.totalorder %s522_s21, %s3983_s14  ;;  %p3986_p2 = scmp.lt.s32.totalorder %s3984_s3, %s3977_s10 }
  0x86   : > { %p3981_p3 = pneg %p3980_p0 }
  0x87   : > { %p3987_p1 = por %p3986_p2, %p3985_p5 }
  0x89   : > { %p3988_p11 = pnand %p3987_p1, %p3981_p3 }
  0x8b   : > { %3991 = shalt.err (!%p3988_p11)
}
  0x8c   : > { %s4147_s5 = smov 128   ;;  %s4148_s24 = smov 8  }
  0x8d   : > { %3475 = dma.hbm_to_vmem [thread:$0]  (!%p4430_p6), %s520_s16, 1024, %s522_s21, %s511_s7, %s4147_s5, %s4147_s5, %s4148_s24  }
  0x8e   : > { %p5224_p4 = scmp.ne.s32.totalorder %s5207_s17, 0 }
  0x8f   : > { %s535_s2 = sand.u32 (!%p5224_p4), 1, %s4104_s22  }
  0x90   : > { %533 = sbr.rel (%p5224_p4) target bundleno = 2843 (0xb1b), region = 80  ;;  %s3039_s8 = sshll.u32 (!%p5224_p4), %s535_s2, 6 }
  0x91   : > { %s536_s12 = scalar_lea.sflag (!%p5224_p4), [#allocation7], %s535_s2  ;;  %s4441_s6 = scalar_lea.vmem (!%p5224_p4), [#allocation6], %s3039_s8 }
  0x95   : > { %4067 = dma.done.wait (%p4393_p13), %s536_s12, 1024  }
  0x96   : > { %4069 = vsyncadd (%p4393_p13), %s536_s12, 4294966272  ;;  %p5225_p8 = scmp.ne.s32.totalorder %s5205_s30, 0 }
  0x98   : > { %4071 = dma.done.wait (%p5225_p8), [#allocation10], 32  }
  0x99   : > { %4073 = vsyncadd (%p5225_p8), [#allocation10], 4294967264 }
  0x9a   : > { %4075 = dma.done.wait (%p5225_p8), [#allocation13], 4096  }
  0x9b   : > { %4077 = vsyncadd (%p5225_p8), [#allocation13], 4294963200 }
  0x9c   : > { %4079 = dma.done.wait (%p5225_p8), [#allocation16], 8192  }
  0x9d   : > { %4081 = vsyncadd (%p5225_p8), [#allocation16], 4294959104  ;;  %s607_s10 = sand.u32 1, %s4092_s19   ;;  %s5226_s13 = sld [smem:[#allocation24_spill]] }
  0x9e   : > { %s3046_s17 = sshll.u32 %s607_s10, 5 }
  0x9f   : > { %s4462_s14 = scalar_lea.vmem [#allocation18], %s3046_s17 }
  0xa3   : > { %p3047_p13 = scmp.ne.s32.totalorder %s5226_s13, 0 }
  0xa4   : > { %s5227_s15 = sld [smem:[#allocation30_spill]] (!%p3047_p13)  ;;  %s4150_s21 = smov (!%p3047_p13), 96  }
  0xa5   : > { %619 = sbr.rel (%p3047_p13) target bundleno = 945 (0x3b1), region = 112  ;;  %s4151_s9 = smov (!%p3047_p13), 64  }
  0xa6   : > { %s4152_s7 = smov (!%p3047_p13), 32  }
  0xaa   : > { %v620_v0 = vld [vmem:[%s4441_s6] sm:$0xff]  ;;  %v622_v1 = vld [vmem:[%s4441_s6 + $0x10] sm:$0xff]  ;;  %v621_v2 = vld [vmem:[%s4441_s6 + $0x8] sm:$0xff]  ;;  %v4149_v62 = vmov 0   ;;  %vm1098_vm0 = vcmask 257024  }
  0xab   : > { %630 = vadd.xlane.f32.xlu0 %v620_v0  ;;  %634 = vadd.xlane.f32.xlu1 %v622_v1  ;;  %v623_v3 = vld [vmem:[%s4441_s6 + $0x18] sm:$0xff]  ;;  %v624_v4 = vld [vmem:[%s4441_s6 + $0x20] sm:$0xff]  ;;  %v625_v5 = vld [vmem:[%s4441_s6 + $0x28] sm:$0xff] }
  0xac   : > { %v626_v6 = vld [vmem:[%s4441_s6 + $0x30] sm:$0xff]  ;;  %v627_v7 = vld [vmem:[%s4441_s6 + $0x38] sm:$0xff]  ;;  %v3621_v45 = vld [vmem:[#allocation12 + $0x7c] ss:$12 sps:$4 sm:$0xff]   ;;  %960 = vmatprep.mubr.bf16.mxu0 %v4149_v62 }
  0xad   : > { %v3614_v8 = vld [vmem:[#allocation12 + $0xac] ss:$12 sps:$4 sm:$0xff]   ;;  %v3616_v9 = vld [vmem:[#allocation12 + $0xa8] ss:$12 sps:$4 sm:$0xff]   ;;  %v3619_v42 = vld [vmem:[#allocation12 + $0xb0] ss:$12 sps:$4 sm:$0xff]  }
  0xae   : > { %928 = vmatprep.subr.bf16.mxu0 %v3614_v8  ;;  %v3617_v41 = vld [vmem:[#allocation12 + $0x94] ss:$12 sps:$4 sm:$0xff]   ;;  %v3620_v43 = vld [vmem:[#allocation12 + $0x90] ss:$12 sps:$4 sm:$0xff]   ;;  %3337 = vmatprep.subr.bf16.mxu1 %v3619_v42  ;;  %v3623_v46 = vld [vmem:[#allocation12 + $0x98] ss:$12 sps:$4 sm:$0xff]  }
  0xaf   : > { %632 = vadd.xlane.f32.xlu0 %v621_v2  ;;  %636 = vadd.xlane.f32.xlu1 %v623_v3  ;;  %v3624_v47 = vld [vmem:[#allocation12 + $0x78] ss:$12 sps:$4 sm:$0xff]   ;;  %v3627_v49 = vld [vmem:[#allocation12 + $0x80] ss:$12 sps:$4 sm:$0xff]   ;;  %v3631_v52 = vld [vmem:[#allocation12 + $0x68] ss:$12 sps:$4 sm:$0xff]  }
  0xb0   : > { %929 = vmatpush1.bf16.msra.mxu0 %v3616_v9  ;;  %3338 = vmatpush3.bf16.msra.mxu1 %v3619_v42  ;;  %v3625_v48 = vld [vmem:[#allocation12 + $0x64] ss:$12 sps:$4 sm:$0xff]   ;;  %v3628_v50 = vld [vmem:[#allocation12 + $0x60] ss:$12 sps:$4 sm:$0xff]   ;;  %v3632_v53 = vld [vmem:[#allocation12 + $0x48] ss:$12 sps:$4 sm:$0xff]  }
  0xb1   : > { %930 = vmatprep.subr.bf16.mxu0 %v3617_v41  ;;  %3339 = vmatprep.subr.bf16.mxu1 %v3623_v46  ;;  %v3629_v51 = vld [vmem:[#allocation12 + $0x4c] ss:$12 sps:$4 sm:$0xff]   ;;  %v3633_v54 = vld [vmem:[#allocation12 + $0x34] ss:$12 sps:$4 sm:$0xff]   ;;  %v3635_v55 = vld [vmem:[#allocation12 + $0x50] ss:$12 sps:$4 sm:$0xff]  }
  0xb2   : > { %v3636_v56 = vld [vmem:[#allocation12 + $0x30] ss:$12 sps:$4 sm:$0xff]   ;;  %v3639_v58 = vld [vmem:[#allocation12 + $0x38] ss:$12 sps:$4 sm:$0xff]   ;;  %v3643_v61 = vld [vmem:[#allocation12 + $0x20] ss:$12 sps:$4 sm:$0xff]  }
  0xb3   : > { %638 = vadd.xlane.f32.xlu0 %v624_v4  ;;  %640 = vadd.xlane.f32.xlu1 %v625_v5  ;;  %v3637_v57 = vld [vmem:[#allocation12 + $0x1c] ss:$12 sps:$4 sm:$0xff]   ;;  %v3640_v59 = vld [vmem:[#allocation12 + $0x18] ss:$12 sps:$4 sm:$0xff]   ;;  %v3644_v63 = vld [vmem:[#allocation12] ss:$12 sps:$4 sm:$0xff]  }
  0xb4   : > { %931 = vmatpush1.bf16.msra.mxu0 %v3620_v43  ;;  %3340 = vmatpush3.bf16.msra.mxu1 %v3623_v46  ;;  %v3641_v60 = vld [vmem:[#allocation12 + $0x4] ss:$12 sps:$4 sm:$0xff]  }
  0xb5   : > { %932 = vmatprep.subr.bf16.mxu0 %v3621_v45  ;;  %3341 = vmatprep.subr.bf16.mxu1 %v3627_v49 }
  0xb7   : > { %642 = vadd.xlane.f32.xlu0 %v626_v6  ;;  %644 = vadd.xlane.f32.xlu1 %v627_v7 }
  0xb8   : > { %933 = vmatpush1.bf16.msra.mxu0 %v3624_v47  ;;  %3342 = vmatpush3.bf16.msra.mxu1 %v3627_v49 }
  0xb9   : > { %934 = vmatprep.subr.bf16.mxu0 %v3625_v48  ;;  %3343 = vmatprep.subr.bf16.mxu1 %v3631_v52 }
  0xbc   : > { %935 = vmatpush1.bf16.msra.mxu0 %v3628_v50  ;;  %3344 = vmatpush3.bf16.msra.mxu1 %v3631_v52 }
  0xbd   : > { %936 = vmatprep.subr.bf16.mxu0 %v3629_v51  ;;  %3345 = vmatprep.subr.bf16.mxu1 %v3635_v55 }
  0xc0   : > { %937 = vmatpush1.bf16.msra.mxu0 %v3632_v53  ;;  %3346 = vmatpush3.bf16.msra.mxu1 %v3635_v55 }
  0xc1   : > { %938 = vmatprep.subr.bf16.mxu0 %v3633_v54  ;;  %3347 = vmatprep.subr.bf16.mxu1 %v3639_v58 }
  0xc4   : > { %939 = vmatpush1.bf16.msra.mxu0 %v3636_v56  ;;  %3348 = vmatpush3.bf16.msra.mxu1 %v3639_v58 }
  0xc5   : > { %940 = vmatprep.subr.bf16.mxu0 %v3637_v57  ;;  %3349 = vmatprep.subr.bf16.mxu1 %v3643_v61 }
  0xc8   : > { %941 = vmatpush1.bf16.msra.mxu0 %v3640_v59  ;;  %3350 = vmatpush3.bf16.msra.mxu1 %v3643_v61 }
  0xc9   : > { %942 = vmatprep.subr.bf16.mxu0 %v3641_v60 }
  0xcc   : > { %943 = vmatpush1.bf16.msra.mxu0 %v3644_v63 }
 0x134   : > { %v631_v10 = vpop.xlane.xlu0 %630  ;;  %v635_v11 = vpop.xlane.xlu1 %634 }
 0x135   : > { %v647_v12 = vmul.f32 0.0078125, %v631_v10  ;;  %v649_v13 = vmul.f32 0.0078125, %v635_v11 }
 0x137   : > { %v4473_v14 = vsub.f32 %v620_v0, %v647_v12  ;;  %v4475_v15 = vsub.f32 %v622_v1, %v649_v13  ;;  %v3645_v0 = vld [vmem:[#allocation12 + $0x8] ss:$12 sps:$4 sm:$0xff]  }
 0x138   : > { %v633_v16 = vpop.xlane.xlu0 %632  ;;  %v637_v17 = vpop.xlane.xlu1 %636  ;;  %3351 = vmatprep.subr.bf16.mxu1 %v3645_v0 }
 0x139   : > { %v648_v18 = vmul.f32 0.0078125, %v633_v16  ;;  %v663_v19 = vmul.f32 %v4473_v14, %v4473_v14  ;;  %v650_v20 = vmul.f32 0.0078125, %v637_v17  ;;  %v665_v23 = vmul.f32 %v4475_v15, %v4475_v15  ;;  %3352 = vmatpush3.bf16.msra.mxu1 %v3645_v0 }
 0x13b   : > { %v4479_v21 = vsub.f32 %v621_v2, %v648_v18  ;;  %671 = vadd.xlane.f32.xlu0 %v663_v19  ;;  %v4481_v22 = vsub.f32 %v623_v3, %v650_v20 }
 0x13c   : > { %v639_v24 = vpop.xlane.xlu0 %638  ;;  %v641_v25 = vpop.xlane.xlu1 %640 }
 0x13d   : > { %v651_v26 = vmul.f32 0.0078125, %v639_v24  ;;  %v664_v27 = vmul.f32 %v4479_v21, %v4479_v21  ;;  %v652_v28 = vmul.f32 0.0078125, %v641_v25  ;;  %v666_v31 = vmul.f32 %v4481_v22, %v4481_v22 }
 0x13f   : > { %v4487_v29 = vsub.f32 %v624_v4, %v651_v26  ;;  %675 = vadd.xlane.f32.xlu0 %v665_v23  ;;  %673 = vadd.xlane.f32.xlu1 %v664_v27  ;;  %v4489_v30 = vsub.f32 %v625_v5, %v652_v28 }
 0x140   : > { %v643_v32 = vpop.xlane.xlu0 %642  ;;  %v645_v33 = vpop.xlane.xlu1 %644 }
 0x141   : > { %v653_v34 = vmul.f32 0.0078125, %v643_v32  ;;  %v667_v35 = vmul.f32 %v4487_v29, %v4487_v29  ;;  %v654_v36 = vmul.f32 0.0078125, %v645_v33  ;;  %v668_v39 = vmul.f32 %v4489_v30, %v4489_v30  ;;  %v3048_v33 = vld [vmem:[#allocation9] ss:$0 sm:$0xff] }
 0x143   : > { %v4495_v37 = vsub.f32 %v626_v6, %v653_v34  ;;  %677 = vadd.xlane.f32.xlu1 %v666_v31  ;;  %679 = vadd.xlane.f32.xlu0 %v667_v35  ;;  %v4497_v38 = vsub.f32 %v627_v7, %v654_v36 }
 0x145   : > { %v669_v40 = vmul.f32 %v4495_v37, %v4495_v37  ;;  %v670_v44 = vmul.f32 %v4497_v38, %v4497_v38 }
 0x147   : > { %681 = vadd.xlane.f32.xlu1 %v668_v39  ;;  %683 = vadd.xlane.f32.xlu0 %v669_v40  ;;  %v3049_v40 = vld [vmem:[#allocation11] ss:$0 sm:$0xff] }
 0x14b   : > { %685 = vadd.xlane.f32.xlu1 %v670_v44 }
 0x1c4   : > { %v672_v1 = vpop.xlane.xlu0 %671 }
 0x1c5   : > { %v687_v2 = vmul.f32 0.0078125, %v672_v1 }
 0x1c7   : > { %v695_v3 = vadd.f32 1e-05, %v687_v2 }
 0x1c8   : > { %v674_v4 = vpop.xlane.xlu1 %673  ;;  %v676_v5 = vpop.xlane.xlu0 %675 }
 0x1c9   : > { %3646 = vrsqrt.f32 %v695_v3  ;;  %v688_v6 = vmul.f32 0.0078125, %v674_v4  ;;  %v689_v7 = vmul.f32 0.0078125, %v676_v5 }
 0x1cb   : > { %v696_v8 = vadd.f32 1e-05, %v688_v6  ;;  %v697_v9 = vadd.f32 1e-05, %v689_v7 }
 0x1cc   : > { %v678_v10 = vpop.xlane.xlu1 %677  ;;  %v680_v11 = vpop.xlane.xlu0 %679 }
 0x1cd   : > { %3648 = vrsqrt.f32 %v696_v8  ;;  %v690_v12 = vmul.f32 0.0078125, %v678_v10  ;;  %v691_v13 = vmul.f32 0.0078125, %v680_v11 }
 0x1ce   : > { %3650 = vrsqrt.f32 %v697_v9 }
 0x1cf   : > { %v698_v16 = vadd.f32 1e-05, %v690_v12  ;;  %v699_v17 = vadd.f32 1e-05, %v691_v13 }
 0x1d0   : > { %v682_v18 = vpop.xlane.xlu1 %681  ;;  %v684_v19 = vpop.xlane.xlu0 %683 }
 0x1d1   : > { %3652 = vrsqrt.f32 %v698_v16  ;;  %v692_v20 = vmul.f32 0.0078125, %v682_v18  ;;  %v693_v23 = vmul.f32 0.0078125, %v684_v19 }
 0x1d2   : > { %3654 = vrsqrt.f32 %v699_v17 }
 0x1d3   : > { %v700_v24 = vadd.f32 1e-05, %v692_v20  ;;  %v701_v25 = vadd.f32 1e-05, %v693_v23 }
 0x1d4   : > { %v686_v26 = vpop.xlane.xlu1 %685 }
 0x1d5   : > { %3656 = vrsqrt.f32 %v700_v24  ;;  %v694_v27 = vmul.f32 0.0078125, %v686_v26 }
 0x1d6   : > { %v3647_v28 = vpop.eup %3646  ;;  %3658 = vrsqrt.f32 %v701_v25 }
 0x1d7   : > { %v702_v31 = vadd.f32 1e-05, %v694_v27  ;;  %v711_v32 = vmul.f32 %v3647_v28, %v4473_v14 }
 0x1d9   : > { %3660 = vrsqrt.f32 %v702_v31  ;;  %v725_v39 = vmul.f32 %v3048_v33, %v711_v32 }
 0x1da   : > { %v3649_v34 = vpop.eup %3648 }
 0x1db   : > { %v3651_v35 = vpop.eup %3650  ;;  %v712_v36 = vmul.f32 %v3649_v34, %v4479_v21  ;;  %v739_v46 = vadd.f32 %v3049_v40, %v725_v39 }
 0x1dc   : > { %v713_v41 = vmul.f32 %v3651_v35, %v4475_v15 }
 0x1dd   : > { %v726_v42 = vmul.f32 %v3048_v33, %v712_v36 }
 0x1de   : > { %v3653_v43 = vpop.eup %3652  ;;  %v727_v44 = vmul.f32 %v3048_v33, %v713_v41 }
 0x1df   : > { %v3655_v45 = vpop.eup %3654  ;;  %v740_v47 = vadd.f32 %v3049_v40, %v726_v42  ;;  %v714_v48 = vmul.f32 %v3653_v43, %v4481_v22 }
 0x1e0   : > { %v715_v14 = vmul.f32 %v3655_v45, %v4487_v29  ;;  %v741_v52 = vadd.f32 %v3049_v40, %v727_v44 }
 0x1e1   : > { %v747_v49 = vpack.c.bf16 %v740_v47, %v739_v46  ;;  %v728_v50 = vmul.f32 %v3048_v33, %v714_v48 }
 0x1e2   : > { %v3657_v51 = vpop.eup %3656  ;;  %v729_v54 = vmul.f32 %v3048_v33, %v715_v14 }
 0x1e3   : > { %v3659_v53 = vpop.eup %3658  ;;  %961 = vmatmul.mubr.bf16.vlgmr.msra.gmra.mxu0 %v747_v49  ;;  %3353 = vmatprep.mubr.bf16.mxu1 %v747_v49  ;;  %v742_v21 = vadd.f32 %v3049_v40, %v728_v50  ;;  %v716_v15 = vmul.f32 %v3657_v51, %v4489_v30 }
 0x1e4   : > { %970 = vmatprep.mubr.bf16.mxu0 %v4149_v62  ;;  %v717_v55 = vmul.f32 %v3659_v53, %v4495_v37  ;;  %v743_v29 = vadd.f32 %v3049_v40, %v729_v54  ;;  %v785_v37 = vlaneseq }
 0x1e5   : > { %v748_v56 = vpack.c.bf16 %v742_v21, %v741_v52  ;;  %v730_v57 = vmul.f32 %v3048_v33, %v716_v15 }
 0x1e6   : > { %v3661_v22 = vpop.eup %3660  ;;  %v731_v60 = vmul.f32 %v3048_v33, %v717_v55  ;;  %v786_v2 = vshrl.u32 %v785_v37, 7 }
 0x1e7   : > { %3354 = vmatmul.mubr.bf16.vlgmr.msra.gmra.mxu1 %v748_v56  ;;  %v744_v58 = vadd.f32 %v3049_v40, %v730_v57  ;;  %v718_v59 = vmul.f32 %v3661_v22, %v4497_v38  ;;  %v783_v38 = vld [vmem:[%s5227_s15] sm:$0x7] }
 0x1e8   : > { %v745_v0 = vadd.f32 %v3049_v40, %v731_v60  ;;  %v787_v3 = vsub.s32 0, %v786_v2  ;;  %v791_v4 = vsub.s32 1, %v786_v2  ;;  %v795_v6 = vsub.s32 2, %v786_v2 }
 0x1e9   : > { %v749_v61 = vpack.c.bf16 %v744_v58, %v743_v29  ;;  %v732_v63 = vmul.f32 %v3048_v33, %v718_v59 }
 0x1ea   : > { %v4520_v5 = vrot.slane %v783_v38, %v787_v3  ;;  %v4522_v7 = vrot.slane %v783_v38, %v791_v4  ;;  %v4525_v10 = vrot.slane %v783_v38, %v795_v6 }
 0x1eb   : > { %971 = vmatmul.mubr.bf16.gmra.mxu0 %v748_v56  ;;  %3357 = vmatprep.mubr.bf16.mxu1 %v749_v61  ;;  %v746_v30 = vadd.f32 %v3049_v40, %v732_v63 }
 0x1ec   : > { %980 = vmatprep.mubr.bf16.mxu0 %v4149_v62 }
 0x1ed   : > { %v750_v1 = vpack.c.bf16 %v746_v30, %v745_v0 }
 0x1ef   : > { %3358 = vmatmul.mubr.bf16.gmra.mxu1 %v750_v1 }
 0x1f3   : > { %981 = vmatmul.mubr.bf16.gmra.mxu0 %v749_v61 }
 0x1f4   : > { %990 = vmatprep.mubr.bf16.mxu0 %v4149_v62 }
 0x1fb   : > { %991 = vmatmul.mubr.bf16.gmra.mxu0 %v750_v1 }
 0x2a3   : > { %v962_v8 = vpop.f32.mrf.mxu0 }
 0x2a4   : > { %v963_v9 = vadd.f32 %v962_v8, %v4520_v5 }
 0x2a5   : > { %v964_v62 = vpop.f32.mrf.mxu0 }
 0x2a6   : > { %v3216_v11 = vpack.c.bf16 %v963_v9, %v963_v9  ;;  %v965_v12 = vadd.f32 %v964_v62, %v4522_v7 }
 0x2a7   : > { %v966_v13 = vpop.f32.mrf.mxu0  ;;  %v3355_v16 = vpop.f32.mrf.mxu1 }
 0x2a8   : > { %1099 = vst.msk [vmem:[#allocation2] sm:$0xf] %vm1098_vm0, %v3216_v11  ;;  %v4529_v17 = vpack.c.bf16 %v965_v12, %v965_v12  ;;  %v967_v18 = vadd.f32 %v966_v13, %v4520_v5  ;;  %v1044_v19 = vadd.f32 %v3355_v16, %v4525_v10  ;;  %1187 = vrot.lane.b32.xlu0 %v3216_v11, %s4150_s21 }
 0x2a9   : > { %v968_v20 = vpop.f32.mrf.mxu0  ;;  %v1035_v23 = vpop.f32.mrf.mxu1 }
 0x2aa   : > { %1139 = vst.msk [vmem:[#allocation3] sm:$0xf] %vm1098_vm0, %v4529_v17  ;;  %v3217_v24 = vpack.c.bf16 %v967_v18, %v967_v18  ;;  %v4536_v25 = vpack.c.bf16 %v1044_v19, %v1044_v19  ;;  %v969_v26 = vadd.f32 %v968_v20, %v4522_v7  ;;  %v1036_v27 = vadd.f32 %v1035_v23, %v4525_v10 }
 0x2ab   : > { %v972_v28 = vpop.f32.mrf.mxu0  ;;  %v3356_v31 = vpop.f32.mrf.mxu1 }
 0x2ac   : > { %1100 = vst.msk [vmem:[#allocation2 + $0x4] sm:$0xf] %vm1098_vm0, %v3217_v24  ;;  %1181 = vst.msk [vmem:[#allocation4 + $0x8] sm:$0xf] %vm1098_vm0, %v4536_v25  ;;  %v4543_v32 = vpack.c.bf16 %v969_v26, %v969_v26  ;;  %v4545_v33 = vpack.c.bf16 %v1036_v27, %v1036_v27  ;;  %v973_v34 = vadd.f32 %v972_v28, %v4520_v5  ;;  %1189 = vrot.lane.b32.xlu1 %v3217_v24, %s4150_s21 }
 0x2ad   : > { %v1047_v35 = vadd.f32 %v3356_v31, %v4525_v10  ;;  %1286 = vrot.lane.b32.xlu0 %v3216_v11, %s4151_s9  ;;  %v974_v36 = vpop.f32.mrf.mxu0  ;;  %v1038_v39 = vpop.f32.mrf.mxu1 }
 0x2ae   : > { %1140 = vst.msk [vmem:[#allocation3 + $0x4] sm:$0xf] %vm1098_vm0, %v4543_v32  ;;  %1179 = vst.msk [vmem:[#allocation4] sm:$0xf] %vm1098_vm0, %v4545_v33  ;;  %v4555_v40 = vpack.c.bf16 %v973_v34, %v973_v34  ;;  %v975_v42 = vadd.f32 %v974_v36, %v4522_v7  ;;  %v1039_v43 = vadd.f32 %v1038_v39, %v4525_v10 }
 0x2af   : > { %v4557_v41 = vpack.c.bf16 %v1047_v35, %v1047_v35  ;;  %v976_v44 = vpop.f32.mrf.mxu0  ;;  %v3359_v45 = vpop.f32.mrf.mxu1 }
 0x2b0   : > { %1101 = vst.msk [vmem:[#allocation2 + $0x8] sm:$0xf] %vm1098_vm0, %v4555_v40  ;;  %v4565_v46 = vpack.c.bf16 %v975_v42, %v975_v42  ;;  %v4567_v47 = vpack.c.bf16 %v1039_v43, %v1039_v43  ;;  %v977_v48 = vadd.f32 %v976_v44, %v4520_v5  ;;  %v1060_v14 = vadd.f32 %v3359_v45, %v4525_v10 }
 0x2b1   : > { %1182 = vst.msk [vmem:[#allocation4 + $0xc] sm:$0xf] %vm1098_vm0, %v4557_v41  ;;  %1288 = vrot.lane.b32.xlu1 %v3217_v24, %s4151_s9  ;;  %1385 = vrot.lane.b32.xlu0 %v3216_v11, %s4152_s7  ;;  %v978_v49 = vpop.f32.mrf.mxu0  ;;  %v1051_v50 = vpop.f32.mrf.mxu1 }
 0x2b2   : > { %1141 = vst.msk [vmem:[#allocation3 + $0x8] sm:$0xf] %vm1098_vm0, %v4565_v46  ;;  %1180 = vst.msk [vmem:[#allocation4 + $0x4] sm:$0xf] %vm1098_vm0, %v4567_v47  ;;  %v4577_v51 = vpack.c.bf16 %v977_v48, %v977_v48  ;;  %v4579_v52 = vpack.c.bf16 %v1060_v14, %v1060_v14  ;;  %v979_v53 = vadd.f32 %v978_v49, %v4522_v7 }
 0x2b3   : > { %v1052_v21 = vadd.f32 %v1051_v50, %v4525_v10  ;;  %v982_v15 = vpop.f32.mrf.mxu0  ;;  %v3360_v54 = vpop.f32.mrf.mxu1 }
 0x2b4   : > { %1102 = vst.msk [vmem:[#allocation2 + $0xc] sm:$0xf] %vm1098_vm0, %v4577_v51  ;;  %1185 = vst.msk [vmem:[#allocation4 + $0x18] sm:$0xf] %vm1098_vm0, %v4579_v52  ;;  %v4587_v55 = vpack.c.bf16 %v979_v53, %v979_v53  ;;  %v983_v57 = vadd.f32 %v982_v15, %v4520_v5  ;;  %v1063_v22 = vadd.f32 %v3360_v54, %v4525_v10 }
 0x2b5   : > { %v4589_v56 = vpack.c.bf16 %v1052_v21, %v1052_v21  ;;  %1387 = vrot.lane.b32.xlu1 %v3217_v24, %s4152_s7  ;;  %1257 = vrot.lane.b32.xlu0 %v4536_v25, %s4150_s21  ;;  %v984_v29 = vpop.f32.mrf.mxu0  ;;  %v1054_v58 = vpop.f32.mrf.mxu1 }
 0x2b6   : > { %1142 = vst.msk [vmem:[#allocation3 + $0xc] sm:$0xf] %vm1098_vm0, %v4587_v55  ;;  %v4600_v59 = vpack.c.bf16 %v983_v57, %v983_v57  ;;  %v4602_v60 = vpack.c.bf16 %v1063_v22, %v1063_v22  ;;  %v985_v61 = vadd.f32 %v984_v29, %v4522_v7  ;;  %v1055_v63 = vadd.f32 %v1054_v58, %v4525_v10 }
 0x2b7   : > { %1183 = vst.msk [vmem:[#allocation4 + $0x10] sm:$0xf] %vm1098_vm0, %v4589_v56  ;;  %v986_v0 = vpop.f32.mrf.mxu0 }
 0x2b8   : > { %1103 = vst.msk [vmem:[#allocation2 + $0x10] sm:$0xf] %vm1098_vm0, %v4600_v59  ;;  %1186 = vst.msk [vmem:[#allocation4 + $0x1c] sm:$0xf] %vm1098_vm0, %v4602_v60  ;;  %v4610_v30 = vpack.c.bf16 %v985_v61, %v985_v61  ;;  %v4612_v1 = vpack.c.bf16 %v1055_v63, %v1055_v63  ;;  %v987_v37 = vadd.f32 %v986_v0, %v4520_v5 }
 0x2b9   : > { %1259 = vrot.lane.b32.xlu1 %v4557_v41, %s4150_s21  ;;  %1356 = vrot.lane.b32.xlu0 %v4536_v25, %s4151_s9  ;;  %v988_v2 = vpop.f32.mrf.mxu0 }
 0x2ba   : > { %1143 = vst.msk [vmem:[#allocation3 + $0x10] sm:$0xf] %vm1098_vm0, %v4610_v30  ;;  %1184 = vst.msk [vmem:[#allocation4 + $0x14] sm:$0xf] %vm1098_vm0, %v4612_v1  ;;  %v4623_v3 = vpack.c.bf16 %v987_v37, %v987_v37  ;;  %v989_v38 = vadd.f32 %v988_v2, %v4522_v7 }
 0x2bb   : > { %v992_v4 = vpop.f32.mrf.mxu0 }
 0x2bc   : > { %1104 = vst.msk [vmem:[#allocation2 + $0x14] sm:$0xf] %vm1098_vm0, %v4623_v3  ;;  %v4628_v6 = vpack.c.bf16 %v989_v38, %v989_v38  ;;  %v993_v8 = vadd.f32 %v992_v4, %v4520_v5 }
 0x2bd   : > { %1358 = vrot.lane.b32.xlu1 %v4557_v41, %s4151_s9  ;;  %1455 = vrot.lane.b32.xlu0 %v4536_v25, %s4152_s7  ;;  %v994_v9 = vpop.f32.mrf.mxu0 }
 0x2be   : > { %1144 = vst.msk [vmem:[#allocation3 + $0x14] sm:$0xf] %vm1098_vm0, %v4628_v6  ;;  %v4637_v10 = vpack.c.bf16 %v993_v8, %v993_v8  ;;  %v995_v62 = vadd.f32 %v994_v9, %v4522_v7 }
 0x2bf   : > { %v996_v11 = vpop.f32.mrf.mxu0 }
 0x2c0   : > { %1105 = vst.msk [vmem:[#allocation2 + $0x18] sm:$0xf] %vm1098_vm0, %v4637_v10  ;;  %v4642_v12 = vpack.c.bf16 %v995_v62, %v995_v62  ;;  %v997_v13 = vadd.f32 %v996_v11, %v4520_v5 }
 0x2c1   : > { %1457 = vrot.lane.b32.xlu1 %v4557_v41, %s4152_s7  ;;  %1220 = vrot.lane.b32.xlu0 %v4529_v17, %s4150_s21  ;;  %v998_v16 = vpop.f32.mrf.mxu0 }
 0x2c2   : > { %1145 = vst.msk [vmem:[#allocation3 + $0x18] sm:$0xf] %vm1098_vm0, %v4642_v12  ;;  %v4651_v18 = vpack.c.bf16 %v997_v13, %v997_v13  ;;  %v999_v19 = vadd.f32 %v998_v16, %v4522_v7 }
 0x2c4   : > { %1106 = vst.msk [vmem:[#allocation2 + $0x1c] sm:$0xf] %vm1098_vm0, %v4651_v18  ;;  %v4656_v20 = vpack.c.bf16 %v999_v19, %v999_v19 }
 0x2c5   : > { %1222 = vrot.lane.b32.xlu1 %v4543_v32, %s4150_s21  ;;  %1319 = vrot.lane.b32.xlu0 %v4529_v17, %s4151_s9 }
 0x2c6   : > { %1146 = vst.msk [vmem:[#allocation3 + $0x1c] sm:$0xf] %vm1098_vm0, %v4656_v20 }
 0x2c9   : > { %1321 = vrot.lane.b32.xlu1 %v4543_v32, %s4151_s9  ;;  %1418 = vrot.lane.b32.xlu0 %v4529_v17, %s4152_s7 }
 0x2cd   : > { %1420 = vrot.lane.b32.xlu1 %v4543_v32, %s4152_s7  ;;  %1253 = vrot.lane.b32.xlu0 %v4545_v33, %s4150_s21 }
 0x2d1   : > { %1255 = vrot.lane.b32.xlu1 %v4567_v47, %s4150_s21  ;;  %1352 = vrot.lane.b32.xlu0 %v4545_v33, %s4151_s9 }
 0x2d5   : > { %1354 = vrot.lane.b32.xlu1 %v4567_v47, %s4151_s9  ;;  %1451 = vrot.lane.b32.xlu0 %v4545_v33, %s4152_s7 }
 0x2d9   : > { %1453 = vrot.lane.b32.xlu1 %v4567_v47, %s4152_s7  ;;  %1290 = vrot.lane.b32.xlu0 %v4555_v40, %s4151_s9 }
 0x2dd   : > { %1191 = vrot.lane.b32.xlu1 %v4555_v40, %s4150_s21  ;;  %1389 = vrot.lane.b32.xlu0 %v4555_v40, %s4152_s7 }
 0x2e1   : > { %1193 = vrot.lane.b32.xlu1 %v4577_v51, %s4150_s21  ;;  %1265 = vrot.lane.b32.xlu0 %v4579_v52, %s4150_s21 }
 0x2e5   : > { %1292 = vrot.lane.b32.xlu1 %v4577_v51, %s4151_s9  ;;  %1364 = vrot.lane.b32.xlu0 %v4579_v52, %s4151_s9 }
 0x2e9   : > { %1391 = vrot.lane.b32.xlu1 %v4577_v51, %s4152_s7  ;;  %1224 = vrot.lane.b32.xlu0 %v4565_v46, %s4150_s21 }
 0x2ed   : > { %1267 = vrot.lane.b32.xlu1 %v4602_v60, %s4150_s21  ;;  %1323 = vrot.lane.b32.xlu0 %v4565_v46, %s4151_s9 }
 0x2f1   : > { %1366 = vrot.lane.b32.xlu1 %v4602_v60, %s4151_s9  ;;  %1422 = vrot.lane.b32.xlu0 %v4565_v46, %s4152_s7 }
 0x2f5   : > { %1226 = vrot.lane.b32.xlu1 %v4587_v55, %s4150_s21  ;;  %1261 = vrot.lane.b32.xlu0 %v4589_v56, %s4150_s21 }
 0x2f9   : > { %1325 = vrot.lane.b32.xlu1 %v4587_v55, %s4151_s9  ;;  %1360 = vrot.lane.b32.xlu0 %v4589_v56, %s4151_s9 }
 0x2fd   : > { %1424 = vrot.lane.b32.xlu1 %v4587_v55, %s4152_s7  ;;  %1459 = vrot.lane.b32.xlu0 %v4589_v56, %s4152_s7 }
 0x301   : > { %1263 = vrot.lane.b32.xlu1 %v4612_v1, %s4150_s21  ;;  %1195 = vrot.lane.b32.xlu0 %v4600_v59, %s4150_s21 }
 0x305   : > { %1362 = vrot.lane.b32.xlu1 %v4612_v1, %s4151_s9  ;;  %1294 = vrot.lane.b32.xlu0 %v4600_v59, %s4151_s9 }
 0x309   : > { %1461 = vrot.lane.b32.xlu1 %v4612_v1, %s4152_s7  ;;  %1393 = vrot.lane.b32.xlu0 %v4600_v59, %s4152_s7 }
 0x30d   : > { %1197 = vrot.lane.b32.xlu1 %v4623_v3, %s4150_s21  ;;  %1228 = vrot.lane.b32.xlu0 %v4610_v30, %s4150_s21 }
 0x311   : > { %1296 = vrot.lane.b32.xlu1 %v4623_v3, %s4151_s9  ;;  %1327 = vrot.lane.b32.xlu0 %v4610_v30, %s4151_s9 }
 0x315   : > { %1395 = vrot.lane.b32.xlu1 %v4623_v3, %s4152_s7  ;;  %1426 = vrot.lane.b32.xlu0 %v4610_v30, %s4152_s7 }
 0x319   : > { %1230 = vrot.lane.b32.xlu1 %v4628_v6, %s4150_s21  ;;  %1199 = vrot.lane.b32.xlu0 %v4637_v10, %s4150_s21 }
 0x31a   : > { %v1188_v5 = vpop.permute.xlu0 %1187 }
 0x31b   : > { %1212 = vst.msk [vmem:[#allocation2 + $0x20] sm:$0xf] %vm1098_vm0, %v1188_v5 }
 0x31d   : > { %1329 = vrot.lane.b32.xlu1 %v4628_v6, %s4151_s9  ;;  %1298 = vrot.lane.b32.xlu0 %v4637_v10, %s4151_s9 }
 0x31e   : > { %v1190_v7 = vpop.permute.xlu1 %1189 }
 0x31f   : > { %1213 = vst.msk [vmem:[#allocation2 + $0x24] sm:$0xf] %vm1098_vm0, %v1190_v7  ;;  %v1287_v17 = vpop.permute.xlu0 %1286 }
 0x320   : > { %1311 = vst.msk [vmem:[#allocation2 + $0x40] sm:$0xf] %vm1098_vm0, %v1287_v17 }
 0x321   : > { %1428 = vrot.lane.b32.xlu1 %v4628_v6, %s4152_s7  ;;  %1397 = vrot.lane.b32.xlu0 %v4637_v10, %s4152_s7 }
 0x323   : > { %v1289_v23 = vpop.permute.xlu1 %1288  ;;  %v1386_v24 = vpop.permute.xlu0 %1385 }
 0x324   : > { %1312 = vst.msk [vmem:[#allocation2 + $0x44] sm:$0xf] %vm1098_vm0, %v1289_v23  ;;  %1410 = vst.msk [vmem:[#allocation2 + $0x60] sm:$0xf] %vm1098_vm0, %v1386_v24 }
 0x325   : > { %1201 = vrot.lane.b32.xlu1 %v4651_v18, %s4150_s21  ;;  %1232 = vrot.lane.b32.xlu0 %v4642_v12, %s4150_s21 }
 0x327   : > { %v1388_v25 = vpop.permute.xlu1 %1387  ;;  %v1258_v26 = vpop.permute.xlu0 %1257 }
 0x328   : > { %1411 = vst.msk [vmem:[#allocation2 + $0x64] sm:$0xf] %vm1098_vm0, %v1388_v25  ;;  %1280 = vst.msk [vmem:[#allocation4 + $0x28] sm:$0xf] %vm1098_vm0, %v1258_v26 }
 0x329   : > { %1300 = vrot.lane.b32.xlu1 %v4651_v18, %s4151_s9  ;;  %1331 = vrot.lane.b32.xlu0 %v4642_v12, %s4151_s9 }
 0x32b   : > { %v1260_v27 = vpop.permute.xlu1 %1259  ;;  %v1357_v28 = vpop.permute.xlu0 %1356 }
 0x32c   : > { %1281 = vst.msk [vmem:[#allocation4 + $0x2c] sm:$0xf] %vm1098_vm0, %v1260_v27  ;;  %1379 = vst.msk [vmem:[#allocation4 + $0x48] sm:$0xf] %vm1098_vm0, %v1357_v28 }
 0x32d   : > { %1399 = vrot.lane.b32.xlu1 %v4651_v18, %s4152_s7  ;;  %1430 = vrot.lane.b32.xlu0 %v4642_v12, %s4152_s7 }
 0x32f   : > { %v1359_v31 = vpop.permute.xlu1 %1358  ;;  %v1456_v32 = vpop.permute.xlu0 %1455 }
 0x330   : > { %1380 = vst.msk [vmem:[#allocation4 + $0x4c] sm:$0xf] %vm1098_vm0, %v1359_v31  ;;  %1478 = vst.msk [vmem:[#allocation4 + $0x68] sm:$0xf] %vm1098_vm0, %v1456_v32 }
 0x331   : > { %1234 = vrot.lane.b32.xlu1 %v4656_v20, %s4150_s21  ;;  %1463 = vrot.lane.b32.xlu0 %v4579_v52, %s4152_s7 }
 0x333   : > { %v1458_v33 = vpop.permute.xlu1 %1457  ;;  %v1221_v34 = vpop.permute.xlu0 %1220 }
 0x334   : > { %1479 = vst.msk [vmem:[#allocation4 + $0x6c] sm:$0xf] %vm1098_vm0, %v1458_v33  ;;  %1245 = vst.msk [vmem:[#allocation3 + $0x20] sm:$0xf] %vm1098_vm0, %v1221_v34 }
 0x335   : > { %1333 = vrot.lane.b32.xlu1 %v4656_v20, %s4151_s9 }
 0x337   : > { %v1223_v35 = vpop.permute.xlu1 %1222  ;;  %v1320_v36 = vpop.permute.xlu0 %1319 }
 0x338   : > { %1246 = vst.msk [vmem:[#allocation3 + $0x24] sm:$0xf] %vm1098_vm0, %v1223_v35  ;;  %1344 = vst.msk [vmem:[#allocation3 + $0x40] sm:$0xf] %vm1098_vm0, %v1320_v36 }
 0x339   : > { %1432 = vrot.lane.b32.xlu1 %v4656_v20, %s4152_s7 }
 0x33b   : > { %v1322_v39 = vpop.permute.xlu1 %1321  ;;  %v1419_v40 = vpop.permute.xlu0 %1418 }
 0x33c   : > { %1345 = vst.msk [vmem:[#allocation3 + $0x44] sm:$0xf] %vm1098_vm0, %v1322_v39  ;;  %1443 = vst.msk [vmem:[#allocation3 + $0x60] sm:$0xf] %vm1098_vm0, %v1419_v40 }
 0x33d   : > { %1465 = vrot.lane.b32.xlu1 %v4602_v60, %s4152_s7 }
 0x33f   : > { %v1421_v41 = vpop.permute.xlu1 %1420  ;;  %v1254_v42 = vpop.permute.xlu0 %1253 }
 0x340   : > { %1444 = vst.msk [vmem:[#allocation3 + $0x64] sm:$0xf] %vm1098_vm0, %v1421_v41  ;;  %1278 = vst.msk [vmem:[#allocation4 + $0x20] sm:$0xf] %vm1098_vm0, %v1254_v42 }
 0x343   : > { %v1256_v43 = vpop.permute.xlu1 %1255  ;;  %v1353_v44 = vpop.permute.xlu0 %1352 }
 0x344   : > { %1279 = vst.msk [vmem:[#allocation4 + $0x24] sm:$0xf] %vm1098_vm0, %v1256_v43  ;;  %1377 = vst.msk [vmem:[#allocation4 + $0x40] sm:$0xf] %vm1098_vm0, %v1353_v44 }
 0x347   : > { %v1355_v45 = vpop.permute.xlu1 %1354  ;;  %v1452_v46 = vpop.permute.xlu0 %1451 }
 0x348   : > { %1378 = vst.msk [vmem:[#allocation4 + $0x44] sm:$0xf] %vm1098_vm0, %v1355_v45  ;;  %1476 = vst.msk [vmem:[#allocation4 + $0x60] sm:$0xf] %vm1098_vm0, %v1452_v46 }
 0x34b   : > { %v1454_v47 = vpop.permute.xlu1 %1453  ;;  %v1291_v48 = vpop.permute.xlu0 %1290 }
 0x34c   : > { %1477 = vst.msk [vmem:[#allocation4 + $0x64] sm:$0xf] %vm1098_vm0, %v1454_v47  ;;  %1313 = vst.msk [vmem:[#allocation2 + $0x48] sm:$0xf] %vm1098_vm0, %v1291_v48 }
 0x34f   : > { %v1192_v14 = vpop.permute.xlu1 %1191  ;;  %v1390_v49 = vpop.permute.xlu0 %1389 }
 0x350   : > { %1214 = vst.msk [vmem:[#allocation2 + $0x28] sm:$0xf] %vm1098_vm0, %v1192_v14  ;;  %1412 = vst.msk [vmem:[#allocation2 + $0x68] sm:$0xf] %vm1098_vm0, %v1390_v49 }
 0x353   : > { %v1194_v50 = vpop.permute.xlu1 %1193  ;;  %v1266_v51 = vpop.permute.xlu0 %1265 }
 0x354   : > { %1215 = vst.msk [vmem:[#allocation2 + $0x2c] sm:$0xf] %vm1098_vm0, %v1194_v50  ;;  %1284 = vst.msk [vmem:[#allocation4 + $0x38] sm:$0xf] %vm1098_vm0, %v1266_v51 }
 0x357   : > { %v1293_v52 = vpop.permute.xlu1 %1292  ;;  %v1365_v53 = vpop.permute.xlu0 %1364 }
 0x358   : > { %1314 = vst.msk [vmem:[#allocation2 + $0x4c] sm:$0xf] %vm1098_vm0, %v1293_v52  ;;  %1383 = vst.msk [vmem:[#allocation4 + $0x58] sm:$0xf] %vm1098_vm0, %v1365_v53 }
 0x35b   : > { %v1392_v21 = vpop.permute.xlu1 %1391  ;;  %v1225_v15 = vpop.permute.xlu0 %1224 }
 0x35c   : > { %1413 = vst.msk [vmem:[#allocation2 + $0x6c] sm:$0xf] %vm1098_vm0, %v1392_v21  ;;  %1247 = vst.msk [vmem:[#allocation3 + $0x28] sm:$0xf] %vm1098_vm0, %v1225_v15 }
 0x35f   : > { %v1268_v54 = vpop.permute.xlu1 %1267  ;;  %v1324_v55 = vpop.permute.xlu0 %1323 }
 0x360   : > { %1285 = vst.msk [vmem:[#allocation4 + $0x3c] sm:$0xf] %vm1098_vm0, %v1268_v54  ;;  %1346 = vst.msk [vmem:[#allocation3 + $0x48] sm:$0xf] %vm1098_vm0, %v1324_v55 }
 0x363   : > { %v1367_v56 = vpop.permute.xlu1 %1366  ;;  %v1423_v57 = vpop.permute.xlu0 %1422 }
 0x364   : > { %1384 = vst.msk [vmem:[#allocation4 + $0x5c] sm:$0xf] %vm1098_vm0, %v1367_v56  ;;  %1445 = vst.msk [vmem:[#allocation3 + $0x68] sm:$0xf] %vm1098_vm0, %v1423_v57 }
 0x367   : > { %v1227_v22 = vpop.permute.xlu1 %1226  ;;  %v1262_v29 = vpop.permute.xlu0 %1261 }
 0x368   : > { %1248 = vst.msk [vmem:[#allocation3 + $0x2c] sm:$0xf] %vm1098_vm0, %v1227_v22  ;;  %1282 = vst.msk [vmem:[#allocation4 + $0x30] sm:$0xf] %vm1098_vm0, %v1262_v29 }
 0x36b   : > { %v1326_v58 = vpop.permute.xlu1 %1325  ;;  %v1361_v59 = vpop.permute.xlu0 %1360 }
 0x36c   : > { %1347 = vst.msk [vmem:[#allocation3 + $0x4c] sm:$0xf] %vm1098_vm0, %v1326_v58  ;;  %1381 = vst.msk [vmem:[#allocation4 + $0x50] sm:$0xf] %vm1098_vm0, %v1361_v59 }
 0x36f   : > { %v1425_v60 = vpop.permute.xlu1 %1424  ;;  %v1460_v61 = vpop.permute.xlu0 %1459 }
 0x370   : > { %1446 = vst.msk [vmem:[#allocation3 + $0x6c] sm:$0xf] %vm1098_vm0, %v1425_v60  ;;  %1480 = vst.msk [vmem:[#allocation4 + $0x70] sm:$0xf] %vm1098_vm0, %v1460_v61 }
 0x373   : > { %v1264_v63 = vpop.permute.xlu1 %1263  ;;  %v1196_v0 = vpop.permute.xlu0 %1195 }
 0x374   : > { %1283 = vst.msk [vmem:[#allocation4 + $0x34] sm:$0xf] %vm1098_vm0, %v1264_v63  ;;  %1216 = vst.msk [vmem:[#allocation2 + $0x30] sm:$0xf] %vm1098_vm0, %v1196_v0 }
 0x377   : > { %v1363_v30 = vpop.permute.xlu1 %1362  ;;  %v1295_v1 = vpop.permute.xlu0 %1294 }
 0x378   : > { %1382 = vst.msk [vmem:[#allocation4 + $0x54] sm:$0xf] %vm1098_vm0, %v1363_v30  ;;  %1315 = vst.msk [vmem:[#allocation2 + $0x50] sm:$0xf] %vm1098_vm0, %v1295_v1 }
 0x37b   : > { %v1462_v37 = vpop.permute.xlu1 %1461  ;;  %v1394_v2 = vpop.permute.xlu0 %1393 }
 0x37c   : > { %1481 = vst.msk [vmem:[#allocation4 + $0x74] sm:$0xf] %vm1098_vm0, %v1462_v37  ;;  %1414 = vst.msk [vmem:[#allocation2 + $0x70] sm:$0xf] %vm1098_vm0, %v1394_v2 }
 0x37f   : > { %v1198_v3 = vpop.permute.xlu1 %1197  ;;  %v1229_v38 = vpop.permute.xlu0 %1228 }
 0x380   : > { %1217 = vst.msk [vmem:[#allocation2 + $0x34] sm:$0xf] %vm1098_vm0, %v1198_v3  ;;  %1249 = vst.msk [vmem:[#allocation3 + $0x30] sm:$0xf] %vm1098_vm0, %v1229_v38 }
 0x383   : > { %v1297_v4 = vpop.permute.xlu1 %1296  ;;  %v1328_v6 = vpop.permute.xlu0 %1327 }
 0x384   : > { %1316 = vst.msk [vmem:[#allocation2 + $0x54] sm:$0xf] %vm1098_vm0, %v1297_v4  ;;  %1348 = vst.msk [vmem:[#allocation3 + $0x50] sm:$0xf] %vm1098_vm0, %v1328_v6 }
 0x387   : > { %v1396_v8 = vpop.permute.xlu1 %1395  ;;  %v1427_v9 = vpop.permute.xlu0 %1426 }
 0x388   : > { %1415 = vst.msk [vmem:[#allocation2 + $0x74] sm:$0xf] %vm1098_vm0, %v1396_v8  ;;  %1447 = vst.msk [vmem:[#allocation3 + $0x70] sm:$0xf] %vm1098_vm0, %v1427_v9 }
 0x38b   : > { %v1231_v10 = vpop.permute.xlu1 %1230  ;;  %v1200_v62 = vpop.permute.xlu0 %1199 }
 0x38c   : > { %1250 = vst.msk [vmem:[#allocation3 + $0x34] sm:$0xf] %vm1098_vm0, %v1231_v10  ;;  %1218 = vst.msk [vmem:[#allocation2 + $0x38] sm:$0xf] %vm1098_vm0, %v1200_v62 }
 0x38f   : > { %v1330_v11 = vpop.permute.xlu1 %1329  ;;  %v1299_v12 = vpop.permute.xlu0 %1298 }
 0x390   : > { %1349 = vst.msk [vmem:[#allocation3 + $0x54] sm:$0xf] %vm1098_vm0, %v1330_v11  ;;  %1317 = vst.msk [vmem:[#allocation2 + $0x58] sm:$0xf] %vm1098_vm0, %v1299_v12 }
 0x393   : > { %v1429_v13 = vpop.permute.xlu1 %1428  ;;  %v1398_v16 = vpop.permute.xlu0 %1397 }
 0x394   : > { %1448 = vst.msk [vmem:[#allocation3 + $0x74] sm:$0xf] %vm1098_vm0, %v1429_v13  ;;  %1416 = vst.msk [vmem:[#allocation2 + $0x78] sm:$0xf] %vm1098_vm0, %v1398_v16 }
 0x397   : > { %v1202_v18 = vpop.permute.xlu1 %1201  ;;  %v1233_v19 = vpop.permute.xlu0 %1232 }
 0x398   : > { %1219 = vst.msk [vmem:[#allocation2 + $0x3c] sm:$0xf] %vm1098_vm0, %v1202_v18  ;;  %1251 = vst.msk [vmem:[#allocation3 + $0x38] sm:$0xf] %vm1098_vm0, %v1233_v19 }
 0x39b   : > { %v1301_v20 = vpop.permute.xlu1 %1300  ;;  %v1332_v5 = vpop.permute.xlu0 %1331 }
 0x39c   : > { %1318 = vst.msk [vmem:[#allocation2 + $0x5c] sm:$0xf] %vm1098_vm0, %v1301_v20  ;;  %1350 = vst.msk [vmem:[#allocation3 + $0x58] sm:$0xf] %vm1098_vm0, %v1332_v5 }
 0x39f   : > { %v1400_v7 = vpop.permute.xlu1 %1399  ;;  %v1431_v17 = vpop.permute.xlu0 %1430 }
 0x3a0   : > { %1417 = vst.msk [vmem:[#allocation2 + $0x7c] sm:$0xf] %vm1098_vm0, %v1400_v7  ;;  %1449 = vst.msk [vmem:[#allocation3 + $0x78] sm:$0xf] %vm1098_vm0, %v1431_v17 }
 0x3a3   : > { %v1235_v23 = vpop.permute.xlu1 %1234  ;;  %v1464_v24 = vpop.permute.xlu0 %1463 }
 0x3a4   : > { %1252 = vst.msk [vmem:[#allocation3 + $0x3c] sm:$0xf] %vm1098_vm0, %v1235_v23  ;;  %1482 = vst.msk [vmem:[#allocation4 + $0x78] sm:$0xf] %vm1098_vm0, %v1464_v24 }
 0x3a7   : > { %v1334_v25 = vpop.permute.xlu1 %1333 }
 0x3a8   : > { %1351 = vst.msk [vmem:[#allocation3 + $0x5c] sm:$0xf] %vm1098_vm0, %v1334_v25 }
 0x3ab   : > { %v1433_v26 = vpop.permute.xlu1 %1432 }
 0x3ac   : > { %1450 = vst.msk [vmem:[#allocation3 + $0x7c] sm:$0xf] %vm1098_vm0, %v1433_v26 }
 0x3af   : > { %v1466_v27 = vpop.permute.xlu1 %1465 }
 0x3b0   : > { %1483 = vst.msk [vmem:[#allocation4 + $0x7c] sm:$0xf] %vm1098_vm0, %v1466_v27 }
 0x3b1 PF: > { %s5228_s3 = sld [smem:[#allocation24_spill]]  ;;  %s4862_s2 = smov 0  }
 0x3b7   : > { %s3098_s5 = sshll.u32 %s5228_s3, 5 }
 0x3b8   : > { %s1485_s24 = scalar_lea.vmem %s4441_s6, %s3098_s5 [#allocation6] }
 0x3b9   : > { %v4854_v28 = vld [vmem:[%s1485_s24] sm:$0xff]  ;;  %v4856_v31 = vld [vmem:[%s1485_s24 + $0x8] sm:$0xff]  ;;  %v4858_v32 = vld [vmem:[%s1485_s24 + $0x10] sm:$0xff] }
 0x3ba   : > { %v4860_v33 = vld [vmem:[%s1485_s24 + $0x18] sm:$0xff] }
 0x3bb LB: >> { %s1496_s12 = sshra.s32 %s3098_s5, 3  ;;  %s3240_s6 = sshll.u32 %s4132_s2, 5  ;;  %vm1546_vm1 = vcmask 261120   ;;  %vm1614_vm2 = vcmask 523264   ;;  %vm1769_vm3 = vcmask 257024   ;;  %s4132_s2 = sphi %s4862_s2, %s1495_s2  }
 0x3bc   : >> { %s3099_s17 = sshll.u32 %s4132_s2, 3  ;;  %s1507_s30 = scalar_lea.vmem [#allocation3], %s3240_s6 }
 0x3bd   : >> { %s1499_s13 = sadd.s32 %s3099_s17, %s1496_s12  ;;  %v3662_v34 = vld [vmem:[%s1507_s30 + $0x18] sm:$0xff]   ;;  %v3663_v35 = vld [vmem:[%s1507_s30 + $0x10] sm:$0xff]   ;;  %v3664_v41 = vld [vmem:[%s1507_s30 + $0x8] sm:$0xff]   ;;  %s1662_s21 = scalar_lea.vmem [#allocation4], %s3240_s6 }
 0x3be   : >> { %s3100_s16 = sshll.u32 %s1499_s13, 2  ;;  %3421 = vmatprep.subr.msk.bf16.mxu0 %vm1546_vm1, %v3662_v34  ;;  %v1563_v36 = vsel %vm1546_vm1, %v3662_v34, 0  ;;  %v1560_v40 = vsel %vm1546_vm1, %v3663_v35, 0  ;;  %v1557_v42 = vsel %vm1546_vm1, %v3664_v41, 0  ;;  %v3665_v43 = vld [vmem:[%s1507_s30] sm:$0xff]   ;;  %v3668_v38 = vld [vmem:[%s1662_s21 + $0x18] sm:$0xff]  }
 0x3bf   : >> { %3362 = vmatpush3.bf16.xpose.msra.mxu0 %v1563_v36  ;;  %s1501_s15 = scalar_lea.vmem [#allocation2], %s3100_s16  ;;  %v1554_v44 = vsel %vm1546_vm1, %v3665_v43, 0  ;;  %v3669_v4 = vld [vmem:[%s1662_s21 + $0x10] sm:$0xff]   ;;  %3373 = vmatprep.subr.bf16.mxu1 %v3668_v38  ;;  %v3670_v6 = vld [vmem:[%s1662_s21 + $0x8] sm:$0xff]   ;;  %v3671_v8 = vld [vmem:[%s1662_s21] sm:$0xff]   ;;  %s3246_s9 = sshll.u32 %s4132_s2, 4 }
 0x3c0   : >> { %3422 = vmatprep.subr.msk.bf16.mxu0 %vm1546_vm1, %v3663_v35  ;;  %v3666_v39 = vld [vmem:[%s1501_s15] sm:$0xff]   ;;  %v3667_v45 = vld [vmem:[%s1501_s15 + $0x8] sm:$0xff]   ;;  %3374 = vmatpush3.bf16.msra.mxu1 %v3668_v38  ;;  %s1768_s7 = scalar_lea.vmem [#allocation5], %s3246_s9  ;;  %s1495_s2 = sadd.s32 1, %s4132_s2  }
 0x3c1   : >> { %3369 = vmatprep.mubr.msk.bf16.mxu0 %vm1546_vm1, %v3666_v39  ;;  %3375 = vmatprep.subr.bf16.mxu1 %v3669_v4  ;;  %p1492_p6 = scmp.ge.s32.totalorder %s1495_s2, 4  }
 0x3c2   : > { %s4153_s3 = smov (%p1492_p6), 64   ;;  %s4154_s24 = smov (%p1492_p6), 32   ;;  %vm1857_vm4 = vcmask (%p1492_p6), 785408  }
 0x3c3   : > { %s4155_s8 = smov (%p1492_p6), 96   ;;  %s5230_s12 = sld [smem:[#allocation32_spill]] (%p1492_p6) }
 0x3c4   : >> { %3376 = vmatpush3.bf16.msra.mxu1 %v3669_v4  ;;  %s5231_s13 = sld [smem:[#allocation33_spill]] (%p1492_p6)  ;;  %s4157_s17 = smov (%p1492_p6), [#allocation18]  }
 0x3c5   : >> { %3377 = vmatprep.subr.bf16.mxu1 %v3670_v6  ;;  %s5232_s15 = sld [smem:[#allocation34_spill]] (%p1492_p6) }
 0x3c6   : > { %s5237_s30 = sld [smem:[#allocation24_spill]] (%p1492_p6) }
 0x3c7   : >> { %3364 = vmatpush3.bf16.xpose.msra.mxu0 %v1560_v40  ;;  %s5238_s16 = sld [smem:[#allocation25_spill]] (%p1492_p6) }
 0x3c8   : >> { %3423 = vmatprep.subr.msk.bf16.mxu0 %vm1546_vm1, %v3664_v41  ;;  %3378 = vmatpush3.bf16.msra.mxu1 %v3670_v6  ;;  %s5239_s5 = sld [smem:[#allocation41_spill]] (%p1492_p6) }
 0x3c9   : >> { %3379 = vmatprep.subr.bf16.mxu1 %v3671_v8 }
 0x3cc   : >> { %3380 = vmatpush3.bf16.msra.mxu1 %v3671_v8 }
 0x3cd   : > { %s3211_s21 = sshll.u32 (%p1492_p6), %s5238_s16, 3 }
 0x3cf   : >> { %3366 = vmatpush3.bf16.xpose.msra.mxu0 %v1557_v42 }
 0x3d0   : >> { %3424 = vmatprep.subr.msk.bf16.mxu0 %vm1546_vm1, %v3665_v43 }
 0x3d7   : >> { %3368 = vmatpush3.bf16.xpose.msra.mxu0 %v1554_v44 }
 0x3de   : >> { %3370 = vmatmul.mubr.msk.bf16.vlgmr.msra.gmra.mxu0 %vm1546_vm1, %v3667_v45 }
 0x49e   : >> { %v3371_v46 = vpop.f32.mrf.mxu0 }
 0x49f   : >> { %v1621_v47 = vsel %vm1614_vm2, %v3371_v46, -inf }
 0x4a0   : >> { %1622 = vmax.xlane.f32.xlu1 %v1621_v47  ;;  %v1599_v48 = vpop.f32.mrf.mxu0  ;;  %v3695_v47 = vld [vmem:[#allocation14 + $0x30] sm:$0xff] (%p1492_p6)  }
 0x4a1   : >> { %v1615_v14 = vsel %vm1614_vm2, %v1599_v48, -inf }
 0x4a2   : >> { %1616 = vmax.xlane.f32.xlu0 %v1615_v14  ;;  %v3372_v49 = vpop.f32.mrf.mxu0  ;;  %v3697_v14 = vld [vmem:[#allocation14 + $0x20] sm:$0xff] (%p1492_p6)  }
 0x4a3   : >> { %v1624_v50 = vsel %vm1614_vm2, %v3372_v49, -inf }
 0x4a4   : >> { %1625 = vmax.xlane.f32.xlu1 %v1624_v50  ;;  %v1602_v51 = vpop.f32.mrf.mxu0  ;;  %v3699_v50 = vld [vmem:[#allocation14 + $0x10] sm:$0xff] (%p1492_p6)  }
 0x4a5   : >> { %v1618_v52 = vsel %vm1614_vm2, %v1602_v51, -inf }
 0x4a6   : >> { %1619 = vmax.xlane.f32.xlu0 %v1618_v52  ;;  %v3703_v52 = vld [vmem:[#allocation14] sm:$0xff] (%p1492_p6)  }
 0x529   : >> { %v1623_v53 = vpop.xlane.xlu1 %1622 }
 0x52a   : >> { %v1629_v21 = vsub.f32 %v3371_v46, %v1623_v53  ;;  %v3694_v46 = vld [vmem:[#allocation14 + $0x38] sm:$0xff] (%p1492_p6)  }
 0x52b   : >> { %v1617_v15 = vpop.xlane.xlu0 %1616  ;;  %3385 = vmatprep.subr.bf16.mxu0 (%p1492_p6), %v3694_v46 }
 0x52c   : >> { %v1627_v54 = vsub.f32 %v1599_v48, %v1617_v15  ;;  %v1635_v56 = vmul.f32 1.442695, %v1629_v21  ;;  %3386 = vmatpush3.bf16.msra.mxu0 (%p1492_p6), %v3694_v46  ;;  %v3696_v48 = vld [vmem:[#allocation14 + $0x28] sm:$0xff] (%p1492_p6)   ;;  %v3716_v46 = vld [vmem:[#allocation15 + $0xa4] ss:$16 sps:$4 sm:$0xff] (%p1492_p6)  }
 0x52d   : >> { %v1626_v55 = vpop.xlane.xlu1 %1625  ;;  %3387 = vmatprep.subr.bf16.mxu0 (%p1492_p6), %v3695_v47 }
 0x52e   : >> { %v1631_v57 = vmul.f32 1.442695, %v1627_v54  ;;  %v1630_v22 = vsub.f32 %v3372_v49, %v1626_v55  ;;  %v3698_v49 = vld [vmem:[#allocation14 + $0x18] sm:$0xff] (%p1492_p6)  }
 0x52f   : >> { %v1620_v29 = vpop.xlane.xlu0 %1619 }
 0x530   : >> { %3672 = vpow2.f32 %v1631_v57  ;;  %v1628_v58 = vsub.f32 %v1602_v51, %v1620_v29  ;;  %v1637_v59 = vmul.f32 1.442695, %v1630_v22  ;;  %3388 = vmatpush3.bf16.msra.mxu0 (%p1492_p6), %v3695_v47  ;;  %v3701_v51 = vld [vmem:[#allocation14 + $0x8] sm:$0xff] (%p1492_p6)  }
 0x531   : >> { %3674 = vpow2.f32 %v1635_v56  ;;  %3389 = vmatprep.subr.bf16.mxu0 (%p1492_p6), %v3696_v48  ;;  %v3720_v47 = vld [vmem:[#allocation15 + $0xac] ss:$16 sps:$4 sm:$0xff] (%p1492_p6)  }
 0x532   : >> { %v1633_v60 = vmul.f32 1.442695, %v1628_v58 }
 0x534   : >> { %3676 = vpow2.f32 %v1633_v60  ;;  %3390 = vmatpush3.bf16.msra.mxu0 (%p1492_p6), %v3696_v48  ;;  %v3718_v48 = vld [vmem:[#allocation15 + $0xa8] ss:$16 sps:$4 sm:$0xff] (%p1492_p6)  }
 0x535   : >> { %3678 = vpow2.f32 %v1637_v59  ;;  %3391 = vmatprep.subr.bf16.mxu0 (%p1492_p6), %v3697_v14 }
 0x538   : > { %3392 = vmatpush3.bf16.msra.mxu0 (%p1492_p6), %v3697_v14  ;;  %v3721_v14 = vld [vmem:[#allocation15 + $0xa0] ss:$16 sps:$4 sm:$0xff] (%p1492_p6)  }
 0x539   : > { %3393 = vmatprep.subr.bf16.mxu0 (%p1492_p6), %v3698_v49 }
 0x53c   : > { %3394 = vmatpush3.bf16.msra.mxu0 (%p1492_p6), %v3698_v49  ;;  %v3722_v49 = vld [vmem:[#allocation15 + $0x84] ss:$16 sps:$4 sm:$0xff] (%p1492_p6)  }
 0x53d   : >> { %v3673_v61 = vpop.eup %3672  ;;  %3395 = vmatprep.subr.bf16.mxu0 (%p1492_p6), %v3699_v50 }
 0x53e   : >> { %v1639_v63 = vsel %vm1614_vm2, %v3673_v61, 0.0  ;;  %v3675_v0 = vpop.eup %3674 }
 0x53f   : >> { %1640 = vadd.xlane.f32.xlu0 %v1639_v63  ;;  %v1645_v1 = vsel %vm1614_vm2, %v3675_v0, 0.0 }
 0x540   : > { %3396 = vmatpush3.bf16.msra.mxu0 (%p1492_p6), %v3699_v50  ;;  %v3726_v50 = vld [vmem:[#allocation15 + $0x8c] ss:$16 sps:$4 sm:$0xff] (%p1492_p6)  }
 0x541   : >> { %v3677_v30 = vpop.eup %3676  ;;  %3397 = vmatprep.subr.bf16.mxu0 (%p1492_p6), %v3701_v51 }
 0x542   : >> { %v1642_v37 = vsel %vm1614_vm2, %v3677_v30, 0.0  ;;  %v3679_v2 = vpop.eup %3678 }
 0x543   : >> { %1646 = vadd.xlane.f32.xlu0 %v1645_v1  ;;  %1643 = vadd.xlane.f32.xlu1 %v1642_v37  ;;  %v1648_v3 = vsel %vm1614_vm2, %v3679_v2, 0.0 }
 0x544   : > { %3398 = vmatpush3.bf16.msra.mxu0 (%p1492_p6), %v3701_v51  ;;  %v3724_v51 = vld [vmem:[#allocation15 + $0x88] ss:$16 sps:$4 sm:$0xff] (%p1492_p6)  }
 0x545   : > { %3399 = vmatprep.subr.bf16.mxu0 (%p1492_p6), %v3703_v52 }
 0x547   : >> { %1649 = vadd.xlane.f32.xlu1 %v1648_v3  ;;  %v3140_v3 = vld [vmem:[%s5231_s13] ss:$0 sm:$0xff] (%p1492_p6)  ;;  %s5236_s13 = sld [smem:[#allocation40_spill]] (%p1492_p6) }
 0x548   : > { %3400 = vmatpush3.bf16.msra.mxu0 (%p1492_p6), %v3703_v52  ;;  %v3727_v52 = vld [vmem:[#allocation15 + $0x80] ss:$16 sps:$4 sm:$0xff] (%p1492_p6)  }
 0x5c8   : >> { %v1641_v9 = vpop.xlane.xlu0 %1640 }
 0x5c9   : >> { %3680 = vrcp.f32 %v1641_v9 }
 0x5cc   : >> { %v1644_v10 = vpop.xlane.xlu1 %1643  ;;  %v1647_v62 = vpop.xlane.xlu0 %1646 }
 0x5cd   : >> { %3682 = vrcp.f32 %v1644_v10 }
 0x5ce   : >> { %3684 = vrcp.f32 %v1647_v62 }
 0x5d0   : >> { %v1650_v11 = vpop.xlane.xlu1 %1649 }
 0x5d1   : >> { %3686 = vrcp.f32 %v1650_v11 }
 0x5d6   : >> { %v3681_v12 = vpop.eup %3680 }
 0x5d7   : >> { %v1655_v16 = vmul.f32 %v3681_v12, %v3673_v61 }
 0x5da   : >> { %v3683_v13 = vpop.eup %3682 }
 0x5db   : >> { %v1656_v18 = vmul.f32 %v3683_v13, %v3677_v30  ;;  %v3685_v19 = vpop.eup %3684  ;;  %v3131_v30 = vld [vmem:[%s5230_s12] ss:$0 sm:$0xff] (%p1492_p6)  ;;  %s5235_s12 = sld [smem:[#allocation39_spill]] (%p1492_p6) }
 0x5dc   : >> { %v1657_v7 = vmul.f32 %v3685_v19, %v3675_v0  ;;  %v3706_v19 = vld [vmem:[#allocation15 + $0xe8] ss:$16 sps:$4 sm:$0xff] (%p1492_p6)  }
 0x5dd   : >> { %v1659_v20 = vpack.c.bf16 %v1656_v18, %v1655_v16 }
 0x5de   : >> { %v3687_v5 = vpop.eup %3686 }
 0x5df   : >> { %3381 = vmatprep.mubr.msk.bf16.mxu1 %vm1614_vm2, %v1659_v20  ;;  %v1658_v17 = vmul.f32 %v3687_v5, %v3679_v2  ;;  %v3708_v20 = vld [vmem:[#allocation15 + $0xec] ss:$16 sps:$4 sm:$0xff] (%p1492_p6)   ;;  %v3709_v5 = vld [vmem:[#allocation15 + $0xe0] ss:$16 sps:$4 sm:$0xff] (%p1492_p6)  }
 0x5e0   : > { %2335 = vmatprep.subr.bf16.mxu0 (%p1492_p6), %v3708_v20 }
 0x5e1   : >> { %v1660_v23 = vpack.c.bf16 %v1658_v17, %v1657_v7 }
 0x5e3   : >> { %3382 = vmatmul.mubr.msk.bf16.vlgmr.msra.gmra.mxu1 %vm1614_vm2, %v1660_v23 }
 0x6a3   : >> { %v3383_v24 = vpop.f32.mrf.mxu1 }
 0x6a4   : >> { %v3244_v25 = vpack.c.bf16 %v3383_v24, %v3383_v24 }
 0x6a5   : >> { %v1735_v26 = vpop.f32.mrf.mxu1 }
 0x6a6   : >> { %1772 = vst.msk [vmem:[%s1768_s7 + $0x8] sm:$0xf] %vm1769_vm3, %v3244_v25  ;;  %v3242_v27 = vpack.c.bf16 %v1735_v26, %v1735_v26 }
 0x6a7   : >> { %v3384_v34 = vpop.f32.mrf.mxu1 }
 0x6a8   : >> { %1770 = vst.msk [vmem:[%s1768_s7] sm:$0xf] %vm1769_vm3, %v3242_v27  ;;  %v3245_v35 = vpack.c.bf16 %v3384_v34, %v3384_v34  ;;  %1494 = sbr.rel (!%p1492_p6) target bundleno = 955 (0x3bb), region = 177 }
 0x6a9   : >> { %v1738_v36 = vpop.f32.mrf.mxu1 }
 0x6aa   : >> { %1773 = vst.msk [vmem:[%s1768_s7 + $0xc] sm:$0xf] %vm1769_vm3, %v3245_v35  ;;  %v3243_v39 = vpack.c.bf16 %v1738_v36, %v1738_v36 }
 0x6ac   : >> { %1771 = vst.msk [vmem:[%s1768_s7 + $0x4] sm:$0xf] %vm1769_vm3, %v3243_v39  ;;  %s5233_s7 = sld [smem:[#allocation35_spill]] (%p1492_p6) }
 0x6b3   : > { %v3688_v40 = vld [vmem:[#allocation5 + $0x20] sm:$0xff]   ;;  %v3689_v41 = vld [vmem:[#allocation5 + $0x10] sm:$0xff]   ;;  %v3690_v42 = vld [vmem:[#allocation5 + $0x28] sm:$0xff]  }
 0x6b4   : > { %1827 = vrot.lane.b32.xlu1 %v3688_v40, %s4153_s3  ;;  %1813 = vrot.lane.b32.xlu0 %v3689_v41, %s4154_s24  ;;  %v3691_v43 = vld [vmem:[#allocation5 + $0x18] sm:$0xff]   ;;  %v3693_v45 = vld [vmem:[#allocation5 + $0x30] sm:$0xff]   ;;  %v3700_v15 = vld [vmem:[#allocation5] sm:$0xff]  }
 0x6b5   : > { %v3692_v44 = vld [vmem:[#allocation5 + $0x38] sm:$0xff]   ;;  %v3702_v54 = vld [vmem:[#allocation5 + $0x8] sm:$0xff]  }
 0x6b8   : > { %1829 = vrot.lane.b32.xlu1 %v3690_v42, %s4153_s3  ;;  %1815 = vrot.lane.b32.xlu0 %v3691_v43, %s4154_s24  ;;  %v3710_v42 = vld [vmem:[#allocation15 + $0xc4] ss:$16 sps:$4 sm:$0xff]   ;;  %v3714_v43 = vld [vmem:[#allocation15 + $0xcc] ss:$16 sps:$4 sm:$0xff]   ;;  %s2864_s3 = sshll.u32 %s4462_s14, 4  ;;  %s5100_s3 = int_to_ptr.vmem [resolvable:$true] %s2864_s3 }
 0x6b9   : > { %s3992_s6 = scalar_lea.vmem %s5100_s3, 512 }
 0x6ba   : > { %p3993_p10 = scmp.ne.s32.totalorder %s5100_s3, %s3992_s6 }
 0x6bc   : > { %1843 = vrot.lane.b32.xlu1 %v3692_v44, %s4155_s8  ;;  %1841 = vrot.lane.b32.xlu0 %v3693_v45, %s4155_s8  ;;  %v3712_v44 = vld [vmem:[#allocation15 + $0xc8] ss:$16 sps:$4 sm:$0xff]   ;;  %v3715_v45 = vld [vmem:[#allocation15 + $0xc0] ss:$16 sps:$4 sm:$0xff]   ;;  %s5234_s8 = sld [smem:[#allocation37_spill]]  ;;  %p3994_p12 = pnand %p3993_p10, %p4408_p7 }
 0x6be   : > { %p3995_p0 = pneg %p3994_p12 }
 0x726   : > { %v1828_v53 = vpop.permute.xlu1 %1827  ;;  %v1814_v21 = vpop.permute.xlu0 %1813 }
 0x727   : > { %v1848_v57 = vsel %vm1546_vm1, %v3700_v15, %v1814_v21  ;;  %v3730_v21 = vld [vmem:[#allocation15 + $0x68] ss:$16 sps:$4 sm:$0xff]   ;;  %v3732_v15 = vld [vmem:[#allocation15 + $0x6c] ss:$16 sps:$4 sm:$0xff]  }
 0x728   : > { %v1854_v59 = vsel %vm1614_vm2, %v1848_v57, %v1828_v53  ;;  %v3728_v53 = vld [vmem:[#allocation15 + $0x64] ss:$16 sps:$4 sm:$0xff]   ;;  %v3736_v57 = vld [vmem:[#allocation15 + $0x48] ss:$16 sps:$4 sm:$0xff]  }
 0x72a   : > { %v1830_v55 = vpop.permute.xlu1 %1829  ;;  %v1816_v56 = vpop.permute.xlu0 %1815 }
 0x72b   : > { %v1851_v22 = vsel %vm1546_vm1, %v3702_v54, %v1816_v56  ;;  %v3733_v54 = vld [vmem:[#allocation15 + $0x60] ss:$16 sps:$4 sm:$0xff]   ;;  %v3738_v56 = vld [vmem:[#allocation15 + $0x4c] ss:$16 sps:$4 sm:$0xff]  }
 0x72c   : > { %v1856_v29 = vsel %vm1614_vm2, %v1851_v22, %v1830_v55  ;;  %v3734_v55 = vld [vmem:[#allocation15 + $0x44] ss:$16 sps:$4 sm:$0xff]   ;;  %v3739_v22 = vld [vmem:[#allocation15 + $0x40] ss:$16 sps:$4 sm:$0xff]  }
 0x72e   : > { %v1844_v58 = vpop.permute.xlu1 %1843  ;;  %v1842_v60 = vpop.permute.xlu0 %1841 }
 0x72f   : > { %v1862_v61 = vsel %vm1857_vm4, %v1856_v29, %v1844_v58  ;;  %v1859_v63 = vsel %vm1857_vm4, %v1854_v59, %v1842_v60  ;;  %v3740_v29 = vld [vmem:[#allocation15 + $0x24] ss:$16 sps:$4 sm:$0xff]   ;;  %v3744_v58 = vld [vmem:[#allocation15 + $0x2c] ss:$16 sps:$4 sm:$0xff]   ;;  %v4156_v59 = vmov 0  }
 0x730   : > { %3401 = vmatprep.mubr.bf16.mxu0 %v1859_v63  ;;  %2314 = vmatprep.mubr.bf16.mxu1 %v4156_v59  ;;  %v3742_v60 = vld [vmem:[#allocation15 + $0x28] ss:$16 sps:$4 sm:$0xff]   ;;  %v3746_v63 = vld [vmem:[#allocation15 + $0x4] ss:$16 sps:$4 sm:$0xff]  }
 0x731   : > { %3402 = vmatmul.mubr.bf16.vlgmr.msra.gmra.mxu0 %v1862_v61  ;;  %v3745_v61 = vld [vmem:[#allocation15 + $0x20] ss:$16 sps:$4 sm:$0xff]  }
 0x732   : > { %2336 = vmatpush1.bf16.msra.mxu0 %v3706_v19  ;;  %2367 = vmatprep.mubr.bf16.mxu0 %v4156_v59 }
 0x733   : > { %2337 = vmatprep.subr.bf16.mxu0 %v3714_v43 }
 0x736   : > { %2338 = vmatpush1.bf16.msra.mxu0 %v3712_v44 }
 0x737   : > { %2339 = vmatprep.subr.bf16.mxu0 %v3720_v47  ;;  %v3754_v47 = vld [vmem:[#allocation17 + $0xf8] sm:$0xff]  }
 0x73a   : > { %2340 = vmatpush1.bf16.msra.mxu0 %v3718_v48  ;;  %v3757_v48 = vld [vmem:[#allocation17 + $0x30] sm:$0xff]  }
 0x73b   : > { %2341 = vmatprep.subr.bf16.mxu0 %v3726_v50  ;;  %v3760_v50 = vld [vmem:[#allocation17 + $0x68] sm:$0xff]  }
 0x73e   : > { %2342 = vmatpush1.bf16.msra.mxu0 %v3724_v51  ;;  %v3761_v51 = vld [vmem:[#allocation17 + $0x28] sm:$0xff]  }
 0x73f   : > { %2343 = vmatprep.subr.bf16.mxu0 %v3732_v15  ;;  %v3765_v15 = vld [vmem:[#allocation17 + $0x20] sm:$0xff]  }
 0x742   : > { %2344 = vmatpush1.bf16.msra.mxu0 %v3730_v21  ;;  %v3764_v21 = vld [vmem:[#allocation17 + $0x60] sm:$0xff]  }
 0x743   : > { %2345 = vmatprep.subr.bf16.mxu0 %v3738_v56  ;;  %v3768_v56 = vld [vmem:[#allocation17 + $0x58] sm:$0xff]  }
 0x746   : > { %2346 = vmatpush1.bf16.msra.mxu0 %v3736_v57  ;;  %v3769_v57 = vld [vmem:[#allocation17 + $0x18] sm:$0xff]  }
 0x747   : > { %2347 = vmatprep.subr.bf16.mxu0 %v3744_v58  ;;  %v3772_v58 = vld [vmem:[#allocation17 + $0x50] sm:$0xff]  }
 0x74a   : > { %2348 = vmatpush1.bf16.msra.mxu0 %v3742_v60  ;;  %v4982_v60 = vld [vmem:[#allocation17 + $0xd0] sm:$0xff]  }
 0x7f1   : > { %v3403_v0 = vpop.f32.mrf.mxu0 }
 0x7f2   : > { %v1978_v37 = vadd.f32 %v3403_v0, %v3131_v30  ;;  %v3750_v0 = vld [vmem:[#allocation15 + $0xc] ss:$16 sps:$4 sm:$0xff]  }
 0x7f3   : > { %v1969_v1 = vpop.f32.mrf.mxu0  ;;  %2349 = vmatprep.subr.bf16.mxu0 %v3750_v0  ;;  %v3777_v0 = vld [vmem:[#allocation17 + $0x8] sm:$0xff]  }
 0x7f4   : > { %v1970_v2 = vadd.f32 %v3131_v30, %v1969_v1  ;;  %v1993_v8 = vmul.f32 %v3140_v3, %v1978_v37  ;;  %v3751_v1 = vld [vmem:[#allocation15] ss:$16 sps:$4 sm:$0xff]  }
 0x7f5   : > { %v3404_v38 = vpop.f32.mrf.mxu0 }
 0x7f6   : > { %v1991_v4 = vmul.f32 %v3140_v3, %v1970_v2  ;;  %v1981_v10 = vadd.f32 %v3404_v38, %v3131_v30  ;;  %v4914_v12 = vadd.f32 %v1993_v8, %v4858_v32 }
 0x7f7   : > { %v1972_v6 = vpop.f32.mrf.mxu0 }
 0x7f8   : > { %v4910_v9 = vadd.f32 %v1991_v4, %v4854_v28  ;;  %v1973_v62 = vadd.f32 %v3131_v30, %v1972_v6  ;;  %v1994_v13 = vmul.f32 %v3140_v3, %v1981_v10  ;;  %v3704_v28 = vld [vmem:[#allocation15 + $0xe4] ss:$16 sps:$4 sm:$0xff]   ;;  %v3748_v30 = vld [vmem:[#allocation15 + $0x8] ss:$16 sps:$4 sm:$0xff]  }
 0x7f9   : > { %2282 = vmatprep.subr.bf16.mxu1 %v3704_v28  ;;  %2350 = vmatpush1.bf16.msra.mxu0 %v3748_v30  ;;  %v4988_v30 = vld [vmem:[#allocation17 + $0xc8] sm:$0xff]  }
 0x7fa   : > { %v1992_v11 = vmul.f32 %v3140_v3, %v1973_v62  ;;  %2001 = vadd.xlane.f32.xlu0 %v4910_v9  ;;  %v4922_v18 = vadd.f32 %v1994_v13, %v4860_v33  ;;  %2283 = vmatpush1.bf16.msra.mxu1 %v3709_v5  ;;  %v3141_v5 = vld [vmem:[%s5232_s15] ss:$0 sm:$0xff]  ;;  %s3210_s15 = sshll.u32 %s5237_s30, 2 }
 0x7fb   : > { %2284 = vmatprep.subr.bf16.mxu1 %v3710_v42  ;;  %3309 = vmatprep.subr.bf16.mxu0 %v3754_v47  ;;  %s2861_s9 = sadd.s32 %s3211_s21, %s3210_s15 }
 0x7fc   : > { %v4917_v16 = vadd.f32 %v1992_v11, %v4856_v31 }
 0x7fe   : > { %2003 = vadd.xlane.f32.xlu1 %v4917_v16  ;;  %2005 = vadd.xlane.f32.xlu0 %v4914_v12 }
 0x7ff   : > { %2285 = vmatpush1.bf16.msra.mxu1 %v3715_v45  ;;  %v3752_v45 = vld [vmem:[#allocation17 + $0x78] sm:$0xff]  }
 0x800   : > { %2286 = vmatprep.subr.bf16.mxu1 %v3716_v46  ;;  %v3753_v46 = vld [vmem:[#allocation17 + $0x38] sm:$0xff]  }
 0x802   : > { %2007 = vadd.xlane.f32.xlu0 %v4922_v18 }
 0x803   : > { %2287 = vmatpush1.bf16.msra.mxu1 %v3721_v14  ;;  %v4958_v14 = vld [vmem:[#allocation17 + $0xf0] sm:$0xff]  }
 0x804   : > { %2288 = vmatprep.subr.bf16.mxu1 %v3722_v49  ;;  %v4960_v49 = vld [vmem:[#allocation17 + $0xb0] sm:$0xff]  }
 0x807   : > { %2289 = vmatpush1.bf16.msra.mxu1 %v3727_v52  ;;  %v4964_v52 = vld [vmem:[#allocation17 + $0xe8] sm:$0xff]  }
 0x808   : > { %2290 = vmatprep.subr.bf16.mxu1 %v3728_v53  ;;  %v4966_v53 = vld [vmem:[#allocation17 + $0xa8] sm:$0xff]  }
 0x80b   : > { %2291 = vmatpush1.bf16.msra.mxu1 %v3733_v54  ;;  %v4970_v54 = vld [vmem:[#allocation17 + $0xe0] sm:$0xff]  }
 0x80c   : > { %2292 = vmatprep.subr.bf16.mxu1 %v3734_v55  ;;  %v4972_v55 = vld [vmem:[#allocation17 + $0xa0] sm:$0xff]  }
 0x80f   : > { %2293 = vmatpush1.bf16.msra.mxu1 %v3739_v22  ;;  %v4976_v22 = vld [vmem:[#allocation17 + $0xd8] sm:$0xff]  }
 0x810   : > { %2294 = vmatprep.subr.bf16.mxu1 %v3740_v29  ;;  %v4978_v29 = vld [vmem:[#allocation17 + $0x98] sm:$0xff]  }
 0x813   : > { %2295 = vmatpush1.bf16.msra.mxu1 %v3745_v61  ;;  %v4984_v61 = vld [vmem:[#allocation17 + $0x90] sm:$0xff]  }
 0x814   : > { %2296 = vmatprep.subr.bf16.mxu1 %v3746_v63  ;;  %v3776_v63 = vld [vmem:[#allocation17 + $0x48] sm:$0xff]  }
 0x817   : > { %2297 = vmatpush1.bf16.msra.mxu1 %v3751_v1  ;;  %v4990_v1 = vld [vmem:[#allocation17 + $0x88] sm:$0xff]  }
 0x818   : > { %3281 = vmatprep.subr.bf16.mxu1 %v3752_v45 }
 0x883   : > { %v2002_v32 = vpop.xlane.xlu0 %2001 }
 0x884   : > { %v2010_v31 = vmul.f32 0.0078125, %v2002_v32 }
 0x886   : > { %v4926_v7 = vsub.f32 %v4910_v9, %v2010_v31 }
 0x887   : > { %v2004_v17 = vpop.xlane.xlu1 %2003  ;;  %v2006_v23 = vpop.xlane.xlu0 %2005 }
 0x888   : > { %v2011_v24 = vmul.f32 0.0078125, %v2004_v17  ;;  %v2012_v33 = vmul.f32 0.0078125, %v2006_v23  ;;  %v2018_v25 = vmul.f32 %v4926_v7, %v4926_v7 }
 0x88a   : > { %v4931_v26 = vsub.f32 %v4917_v16, %v2011_v24  ;;  %v4934_v27 = vsub.f32 %v4914_v12, %v2012_v33  ;;  %2022 = vadd.xlane.f32.xlu1 %v2018_v25  ;;  %v3142_v24 = vld [vmem:[%s5233_s7] ss:$0 sm:$0xff]  ;;  %s3212_s7 = sshll.u32 %s2861_s9, 7 }
 0x88b   : > { %v2008_v34 = vpop.xlane.xlu0 %2007  ;;  %s5098_s2 = scalar_lea.hbm %s5239_s5, %s3212_s7 }
 0x88c   : > { %v2013_v35 = vmul.f32 0.0078125, %v2008_v34  ;;  %v2019_v36 = vmul.f32 %v4931_v26, %v4931_v26  ;;  %v2020_v39 = vmul.f32 %v4934_v27, %v4934_v27 }
 0x88e   : > { %v4941_v40 = vsub.f32 %v4922_v18, %v2013_v35  ;;  %2024 = vadd.xlane.f32.xlu0 %v2019_v36  ;;  %2026 = vadd.xlane.f32.xlu1 %v2020_v39 }
 0x890   : > { %v2021_v41 = vmul.f32 %v4941_v40, %v4941_v40 }
 0x892   : > { %2028 = vadd.xlane.f32.xlu0 %v2021_v41 }
 0x913   : > { %v2023_v37 = vpop.xlane.xlu1 %2022 }
 0x914   : > { %v2030_v2 = vmul.f32 0.0078125, %v2023_v37  ;;  %v3780_v37 = vld [vmem:[#allocation17 + $0x40] sm:$0xff]  }
 0x916   : > { %v2034_v3 = vadd.f32 1e-05, %v2030_v2  ;;  %v3781_v2 = vld [vmem:[#allocation17] sm:$0xff]  }
 0x917   : > { %v2027_v38 = vpop.xlane.xlu1 %2026  ;;  %v2025_v4 = vpop.xlane.xlu0 %2024 }
 0x918   : > { %3784 = vrsqrt.f32 %v2034_v3  ;;  %v2032_v6 = vmul.f32 0.0078125, %v2027_v38  ;;  %v2031_v8 = vmul.f32 0.0078125, %v2025_v4  ;;  %v4994_v3 = vld [vmem:[#allocation17 + $0xc0] sm:$0xff]   ;;  %v2102_v4 = vlaneseq }
 0x919   : > { %v4996_v38 = vld [vmem:[#allocation17 + $0x80] sm:$0xff]  }
 0x91a   : > { %v2035_v10 = vadd.f32 1e-05, %v2031_v8  ;;  %v2036_v62 = vadd.f32 1e-05, %v2032_v6  ;;  %v2103_v6 = vshrl.u32 %v2102_v4, 7 }
 0x91b   : > { %v2029_v11 = vpop.xlane.xlu0 %2028 }
 0x91c   : > { %v2033_v13 = vmul.f32 0.0078125, %v2029_v11  ;;  %3786 = vrsqrt.f32 %v2035_v10  ;;  %v2104_v8 = vsub.s32 0, %v2103_v6  ;;  %v2112_v10 = vsub.s32 2, %v2103_v6 }
 0x91d   : > { %3788 = vrsqrt.f32 %v2036_v62  ;;  %v2100_v62 = vld [vmem:[%s5234_s8] sm:$0xf]  ;;  %v2108_v11 = vsub.s32 1, %v2103_v6 }
 0x91e   : > { %v2037_v28 = vadd.f32 1e-05, %v2033_v13  ;;  %v2116_v13 = vsub.s32 3, %v2103_v6 }
 0x920   : > { %3790 = vrsqrt.f32 %v2037_v28 }
 0x925   : > { %v3785_v19 = vpop.eup %3784 }
 0x926   : > { %v2042_v20 = vmul.f32 %v3785_v19, %v4926_v7 }
 0x928   : > { %v2052_v17 = vmul.f32 %v3141_v5, %v2042_v20  ;;  %v2105_v20 = vrot.slane %v2100_v62, %v2104_v8 }
 0x929   : > { %v3787_v32 = vpop.eup %3786 }
 0x92a   : > { %v2043_v31 = vmul.f32 %v3787_v32, %v4931_v26  ;;  %v3789_v23 = vpop.eup %3788  ;;  %v2062_v35 = vadd.f32 %v3142_v24, %v2052_v17  ;;  %v2109_v32 = vrot.slane %v2100_v62, %v2108_v11  ;;  %v2117_v17 = vrot.slane %v2100_v62, %v2116_v13 }
 0x92b   : > { %v2044_v7 = vmul.f32 %v3789_v23, %v4934_v27  ;;  %v3756_v27 = vld [vmem:[#allocation17 + $0x70] sm:$0xff]  }
 0x92c   : > { %v2053_v25 = vmul.f32 %v3141_v5, %v2043_v31 }
 0x92d   : > { %v3791_v33 = vpop.eup %3790  ;;  %v2054_v42 = vmul.f32 %v3141_v5, %v2044_v7 }
 0x92e   : > { %v2045_v34 = vmul.f32 %v3791_v33, %v4941_v40  ;;  %v2063_v36 = vadd.f32 %v3142_v24, %v2053_v25  ;;  %v4955_v40 = vld [vmem:[#allocation17 + $0xb8] sm:$0xff]  }
 0x92f   : > { %v2064_v43 = vadd.f32 %v3142_v24, %v2054_v42 }
 0x930   : > { %v2066_v39 = vpack.c.bf16 %v2063_v36, %v2062_v35  ;;  %v2055_v41 = vmul.f32 %v3141_v5, %v2045_v34  ;;  %v5003_v5 = vrot.slane %v2100_v62, %v2112_v10 }
 0x932   : > { %2315 = vmatmul.mubr.bf16.vlgmr.msra.gmra.mxu1 %v2066_v39  ;;  %2368 = vmatmul.mubr.bf16.vlgmr.msra.gmra.mxu0 %v2066_v39  ;;  %v2065_v26 = vadd.f32 %v3142_v24, %v2055_v41 }
 0x933   : > { %2324 = vmatprep.mubr.bf16.mxu1 %v4156_v59  ;;  %2377 = vmatprep.mubr.bf16.mxu0 %v4156_v59  ;;  %v3773_v59 = vld [vmem:[#allocation17 + $0x10] sm:$0xff]  }
 0x934   : > { %v2067_v44 = vpack.c.bf16 %v2065_v26, %v2064_v43  ;;  %3282 = vmatpush3.bf16.msra.mxu1 %v3753_v46  ;;  %3310 = vmatpush3.bf16.msra.mxu0 %v4955_v40 }
 0x935   : > { %3283 = vmatprep.subr.bf16.mxu1 %v3756_v27  ;;  %3311 = vmatprep.subr.bf16.mxu0 %v4958_v14 }
 0x938   : > { %3284 = vmatpush3.bf16.msra.mxu1 %v3757_v48  ;;  %3312 = vmatpush3.bf16.msra.mxu0 %v4960_v49 }
 0x939   : > { %3285 = vmatprep.subr.bf16.mxu1 %v3760_v50  ;;  %3313 = vmatprep.subr.bf16.mxu0 %v4964_v52 }
 0x93a   : > { %2325 = vmatmul.mubr.bf16.gmra.mxu1 %v2067_v44  ;;  %2378 = vmatmul.mubr.bf16.gmra.mxu0 %v2067_v44 }
 0x93c   : > { %3286 = vmatpush3.bf16.msra.mxu1 %v3761_v51  ;;  %3314 = vmatpush3.bf16.msra.mxu0 %v4966_v53 }
 0x93d   : > { %3287 = vmatprep.subr.bf16.mxu1 %v3764_v21  ;;  %3315 = vmatprep.subr.bf16.mxu0 %v4970_v54 }
 0x940   : > { %3288 = vmatpush3.bf16.msra.mxu1 %v3765_v15  ;;  %3316 = vmatpush3.bf16.msra.mxu0 %v4972_v55 }
 0x941   : > { %3289 = vmatprep.subr.bf16.mxu1 %v3768_v56  ;;  %3317 = vmatprep.subr.bf16.mxu0 %v4976_v22 }
 0x944   : > { %3290 = vmatpush3.bf16.msra.mxu1 %v3769_v57  ;;  %3318 = vmatpush3.bf16.msra.mxu0 %v4978_v29 }
 0x945   : > { %3291 = vmatprep.subr.bf16.mxu1 %v3772_v58  ;;  %3319 = vmatprep.subr.bf16.mxu0 %v4982_v60 }
 0x948   : > { %3292 = vmatpush3.bf16.msra.mxu1 %v3773_v59  ;;  %3320 = vmatpush3.bf16.msra.mxu0 %v4984_v61 }
 0x949   : > { %3293 = vmatprep.subr.bf16.mxu1 %v3776_v63  ;;  %3321 = vmatprep.subr.bf16.mxu0 %v4988_v30 }
 0x94c   : > { %3294 = vmatpush3.bf16.msra.mxu1 %v3777_v0  ;;  %3322 = vmatpush3.bf16.msra.mxu0 %v4990_v1 }
 0x94d   : > { %3295 = vmatprep.subr.bf16.mxu1 %v3780_v37  ;;  %3323 = vmatprep.subr.bf16.mxu0 %v4994_v3 }
 0x950   : > { %3296 = vmatpush3.bf16.msra.mxu1 %v3781_v2  ;;  %3324 = vmatpush3.bf16.msra.mxu0 %v4996_v38 }
 0x951   : > { %3405 = vmatprep.subr.bf16.mxu1 %v3754_v47 }
 0x9f2   : > { %v2316_v28 = vpop.f32.mrf.mxu1  ;;  %v2369_v19 = vpop.f32.mrf.mxu0 }
 0x9f3   : > { %v2317_v25 = vadd.f32 %v2316_v28, %v2105_v20  ;;  %v2370_v34 = vadd.f32 %v2369_v19, %v5003_v5 }
 0x9f4   : > { %v2318_v31 = vpop.f32.mrf.mxu1  ;;  %v2371_v23 = vpop.f32.mrf.mxu0 }
 0x9f5   : > { %v2319_v7 = vadd.f32 %v2318_v31, %v2109_v32  ;;  %v2372_v39 = vadd.f32 %v2371_v23, %v2117_v17 }
 0x9f6   : > { %v2320_v24 = vpop.f32.mrf.mxu1  ;;  %v2373_v33 = vpop.f32.mrf.mxu0 }
 0x9f7   : > { %v2321_v35 = vadd.f32 %v2320_v24, %v2105_v20  ;;  %v2374_v36 = vadd.f32 %v2373_v33, %v5003_v5 }
 0x9f8   : > { %v2322_v41 = vpop.f32.mrf.mxu1  ;;  %v2375_v42 = vpop.f32.mrf.mxu0 }
 0x9f9   : > { %v5007_v26 = vpack.c.bf16 %v2321_v35, %v2317_v25  ;;  %v5009_v43 = vpack.c.bf16 %v2374_v36, %v2370_v34  ;;  %v2323_v44 = vadd.f32 %v2322_v41, %v2109_v32  ;;  %v2376_v45 = vadd.f32 %v2375_v42, %v2117_v17 }
 0x9fa   : > { %v2326_v46 = vpop.f32.mrf.mxu1  ;;  %v2379_v47 = vpop.f32.mrf.mxu0 }
 0x9fb   : > { %v2396_v27 = vmul.bf16 %v5007_v26, %v5007_v26  ;;  %v2398_v48 = vmul.bf16 %v5009_v43, %v5009_v43  ;;  %v5015_v50 = vpack.c.bf16 %v2323_v44, %v2319_v7  ;;  %v5017_v51 = vpack.c.bf16 %v2376_v45, %v2372_v39 }
 0x9fc   : > { %v2328_v21 = vpop.f32.mrf.mxu1  ;;  %v2381_v15 = vpop.f32.mrf.mxu0  ;;  %v2327_v8 = vadd.f32 %v2326_v46, %v2105_v20 }
 0x9fd   : > { %v2404_v56 = vmul.bf16 %v2396_v27, %v5007_v26  ;;  %v2406_v57 = vmul.bf16 %v2398_v48, %v5009_v43  ;;  %v2397_v58 = vmul.bf16 %v5015_v50, %v5015_v50  ;;  %v2399_v59 = vmul.bf16 %v5017_v51, %v5017_v51 }
 0x9fe   : > { %v2330_v63 = vpop.f32.mrf.mxu1  ;;  %v2383_v0 = vpop.f32.mrf.mxu0  ;;  %v2329_v10 = vadd.f32 %v2328_v21, %v2109_v32  ;;  %v2382_v24 = vadd.f32 %v2381_v15, %v2117_v17  ;;  %v2380_v15 = vadd.f32 %v2379_v47, %v5003_v5 }
 0x9ff   : > { %v2412_v37 = vmul.bf16 1027030327, %v2404_v56  ;;  %v2414_v2 = vmul.bf16 1027030327, %v2406_v57  ;;  %v2405_v4 = vmul.bf16 %v2397_v58, %v5015_v50  ;;  %v2407_v6 = vmul.bf16 %v2399_v59, %v5017_v51 }
 0xa00   : > { %v2331_v62 = vadd.f32 %v2330_v63, %v2105_v20  ;;  %v2332_v11 = vpop.f32.mrf.mxu1  ;;  %v2385_v13 = vpop.f32.mrf.mxu0  ;;  %v2384_v46 = vadd.f32 %v2383_v0, %v5003_v5 }
 0xa01   : > { %v2420_v28 = vadd.bf16 %v2412_v37, %v5007_v26  ;;  %v2422_v19 = vadd.bf16 %v2414_v2, %v5009_v43  ;;  %v2413_v31 = vmul.bf16 1027030327, %v2405_v4  ;;  %v2415_v23 = vmul.bf16 1027030327, %v2407_v6 }
 0xa02   : > { %v5029_v33 = vpack.c.bf16 %v2331_v62, %v2327_v8  ;;  %v2333_v25 = vadd.f32 %v2332_v11, %v2109_v32  ;;  %v2386_v34 = vadd.f32 %v2385_v13, %v2117_v17  ;;  %v5049_v59 = vpack.c.bf16 %v2384_v46, %v2380_v15 }
 0xa03   : > { %v2428_v35 = vmul.bf16 1061961548, %v2420_v28  ;;  %v2430_v36 = vmul.bf16 1061961548, %v2422_v19  ;;  %v2421_v7 = vadd.bf16 %v2413_v31, %v5015_v50  ;;  %v2423_v39 = vadd.bf16 %v2415_v23, %v5017_v51 }
 0xa04   : > { %v2400_v20 = vmul.bf16 %v5029_v33, %v5029_v33  ;;  %v5035_v41 = vpack.c.bf16 %v2333_v25, %v2329_v10  ;;  %v5037_v42 = vpack.c.bf16 %v2386_v34, %v2382_v24  ;;  %v2402_v6 = vmul.bf16 %v5049_v59, %v5049_v59 }
 0xa05   : > { %3792 = vtanh.bf16 %v2428_v35  ;;  %v2429_v44 = vmul.bf16 1061961548, %v2421_v7  ;;  %v2431_v45 = vmul.bf16 1061961548, %v2423_v39 }
 0xa06   : > { %3794 = vtanh.bf16 %v2430_v36  ;;  %v2408_v32 = vmul.bf16 %v2400_v20, %v5029_v33  ;;  %v2401_v17 = vmul.bf16 %v5035_v41, %v5035_v41  ;;  %v2403_v27 = vmul.bf16 %v5037_v42, %v5037_v42 }
 0xa07   : > { %3796 = vtanh.bf16 %v2429_v44  ;;  %v2410_v47 = vmul.bf16 %v2402_v6, %v5049_v59 }
 0xa08   : > { %v2416_v48 = vmul.bf16 1027030327, %v2408_v32  ;;  %v2409_v21 = vmul.bf16 %v2401_v17, %v5035_v41  ;;  %3798 = vtanh.bf16 %v2431_v45  ;;  %v2411_v56 = vmul.bf16 %v2403_v27, %v5037_v42 }
 0xa09   : > { %v2418_v23 = vmul.bf16 1027030327, %v2410_v47 }
 0xa0a   : > { %v2424_v57 = vadd.bf16 %v2416_v48, %v5029_v33  ;;  %v2417_v58 = vmul.bf16 1027030327, %v2409_v21  ;;  %v2419_v63 = vmul.bf16 1027030327, %v2411_v56 }
 0xa0b   : > { %v2426_v39 = vadd.bf16 %v2418_v23, %v5049_v59 }
 0xa0c   : > { %v2425_v0 = vadd.bf16 %v2417_v58, %v5035_v41  ;;  %v2432_v37 = vmul.bf16 1061961548, %v2424_v57  ;;  %v2427_v2 = vadd.bf16 %v2419_v63, %v5037_v42 }
 0xa0d   : > { %v2434_v27 = vmul.bf16 1061961548, %v2426_v39 }
 0xa0e   : > { %v2433_v4 = vmul.bf16 1061961548, %v2425_v0  ;;  %3800 = vtanh.bf16 %v2432_v37  ;;  %v2435_v8 = vmul.bf16 1061961548, %v2427_v2 }
 0xa10   : > { %3802 = vtanh.bf16 %v2433_v4 }
 0xa11   : > { %3804 = vtanh.bf16 %v2435_v8 }
 0xa12   : > { %3806 = vtanh.bf16 %v2434_v27 }
 0xa13   : > { %v3793_v5 = vpop.eup %3792 }
 0xa14   : > { %v3795_v10 = vpop.eup %3794  ;;  %v2444_v62 = vadd.bf16 1065369472, %v3793_v5 }
 0xa15   : > { %v3797_v11 = vpop.eup %3796  ;;  %v2446_v13 = vadd.bf16 1065369472, %v3795_v10 }
 0xa16   : > { %v3799_v28 = vpop.eup %3798  ;;  %v2445_v19 = vadd.bf16 1065369472, %v3797_v11  ;;  %v2452_v31 = vmul.bf16 1056980736, %v2444_v62 }
 0xa17   : > { %v2447_v24 = vadd.bf16 1065369472, %v3799_v28  ;;  %v2454_v25 = vmul.bf16 1056980736, %v2446_v13 }
 0xa18   : > { %v2453_v34 = vmul.bf16 1056980736, %v2445_v19  ;;  %v2460_v7 = vmul.bf16 %v2452_v31, %v5007_v26 }
 0xa19   : > { %v2455_v35 = vmul.bf16 1056980736, %v2447_v24  ;;  %v2462_v44 = vmul.bf16 %v2454_v25, %v5009_v43 }
 0xa1a   : > { %v2461_v36 = vmul.bf16 %v2453_v34, %v5015_v50 }
 0xa1b   : > { %v2463_v20 = vmul.bf16 %v2455_v35, %v5017_v51 }
 0xa1c   : > { %2763 = vmatprep.mubr.bf16.mxu1 %v2461_v36  ;;  %v3801_v45 = vpop.eup %3800 }
 0xa1d   : > { %2812 = vmatprep.mubr.bf16.mxu0 %v2463_v20  ;;  %2764 = vmatmul.mubr.bf16.vlgmr.msra.gmra.mxu1 %v2460_v7  ;;  %v2448_v17 = vadd.bf16 1065369472, %v3801_v45 }
 0xa1e   : > { %v3803_v32 = vpop.eup %3802  ;;  %3413 = vmatpush3.bf16.msra.mxu1 %v4955_v40  ;;  %2813 = vmatmul.mubr.bf16.vlgmr.msra.gmra.mxu0 %v2462_v44 }
 0xa1f   : > { %v3805_v46 = vpop.eup %3804  ;;  %3406 = vmatprep.subr.bf16.mxu1 %v4958_v14  ;;  %v2449_v26 = vadd.bf16 1065369472, %v3803_v32  ;;  %v2456_v50 = vmul.bf16 1056980736, %v2448_v17 }
 0xa20   : > { %v2451_v48 = vadd.bf16 1065369472, %v3805_v46  ;;  %v3807_v14 = vpop.eup %3806 }
 0xa21   : > { %v2457_v21 = vmul.bf16 1056980736, %v2449_v26  ;;  %v2464_v40 = vmul.bf16 %v2456_v50, %v5029_v33 }
 0xa22   : > { %3414 = vmatpush3.bf16.msra.mxu1 %v4960_v49  ;;  %v2459_v43 = vmul.bf16 1056980736, %v2451_v48  ;;  %v2450_v49 = vadd.bf16 1065369472, %v3807_v14 }
 0xa23   : > { %v2465_v51 = vmul.bf16 %v2457_v21, %v5035_v41  ;;  %3407 = vmatprep.subr.bf16.mxu1 %v4964_v52 }
 0xa24   : > { %v2467_v15 = vmul.bf16 %v2459_v43, %v5037_v42  ;;  %v2458_v52 = vmul.bf16 1056980736, %v2450_v49 }
 0xa25   : > { %2771 = vmatprep.mubr.bf16.mxu1 %v2465_v51 }
 0xa26   : > { %2772 = vmatmul.mubr.bf16.gmra.mxu1 %v2464_v40 }
 0xa27   : > { %3415 = vmatpush3.bf16.msra.mxu1 %v4966_v53  ;;  %2820 = vmatprep.mubr.bf16.mxu1 %v2467_v15  ;;  %v2466_v53 = vmul.bf16 %v2458_v52, %v5049_v59 }
 0xa28   : > { %3408 = vmatprep.subr.bf16.mxu1 %v4970_v54 }
 0xa2b   : > { %3416 = vmatpush3.bf16.msra.mxu1 %v4972_v55 }
 0xa2c   : > { %3409 = vmatprep.subr.bf16.mxu1 %v4976_v22  ;;  %v3175_v22 = vld [vmem:[%s5235_s12] ss:$0 sm:$0xff]  ;;  %s5106_s12 = scalar_lea.sflag [#allocation8], %s607_s10 }
 0xa2f   : > { %3417 = vmatpush3.bf16.msra.mxu1 %v4978_v29 }
 0xa30   : > { %3410 = vmatprep.subr.bf16.mxu1 %v4982_v60 }
 0xa33   : > { %3418 = vmatpush3.bf16.msra.mxu1 %v4984_v61 }
 0xa34   : > { %3411 = vmatprep.subr.bf16.mxu1 %v4988_v30 }
 0xa37   : > { %3419 = vmatpush3.bf16.msra.mxu1 %v4990_v1 }
 0xa38   : > { %3412 = vmatprep.subr.bf16.mxu1 %v4994_v3 }
 0xa3b   : > { %3420 = vmatpush3.bf16.msra.mxu1 %v4996_v38  ;;  %v3208_v38 = vld [vmem:[%s5236_s13] ss:$0 sm:$0xff]  ;;  %s3996_s13 = sshll.u32 %s4157_s17, 4  ;;  %s3997_s13 = int_to_ptr.vmem [resolvable:$false] %s3996_s13 }
 0xa3c   : > { %s3998_s30 = scalar_lea.vmem %s3997_s13, 1024  ;;  %p3999_p3 = scmp.lt.s32.totalorder %s5100_s3, %s3997_s13 }
 0xa3d   : > { %p4000_p5 = scmp.lt.s32.totalorder %s3998_s30, %s3992_s6 }
 0xa3e   : > { %2821 = vmatmul.mubr.bf16.vlgmr.msra.gmra.mxu1 %v2466_v53 }
 0xa3f   : > { %p4001_p2 = por %p4000_p5, %p3999_p3 }
 0xa41   : > { %p4002_p1 = pnand %p4001_p2, %p3995_p0 }
 0xadd   : > { %v3297_v54 = vpop.f32.mrf.mxu1 }
 0xade   : > { %v3325_v55 = vpop.f32.mrf.mxu0 }
 0xadf   : > { %v3298_v29 = vpop.f32.mrf.mxu1 }
 0xae0   : > { %v3299_v60 = vadd.f32 %v3298_v29, %v3297_v54  ;;  %v3326_v61 = vpop.f32.mrf.mxu0 }
 0xae1   : > { %v3300_v30 = vpop.f32.mrf.mxu1  ;;  %v3327_v33 = vadd.f32 %v3326_v61, %v3325_v55 }
 0xae2   : > { %v2766_v1 = vadd.f32 %v3299_v60, %v3175_v22  ;;  %v3328_v3 = vpop.f32.mrf.mxu0 }
 0xae3   : > { %v3301_v41 = vpop.f32.mrf.mxu1 }
 0xae4   : > { %v2815_v42 = vadd.f32 %v3327_v33, %v2766_v1  ;;  %v3302_v56 = vadd.f32 %v3301_v41, %v3300_v30  ;;  %v3329_v57 = vpop.f32.mrf.mxu0 }
 0xae5   : > { %v3330_v63 = vadd.f32 %v3329_v57, %v3328_v3 }
 0xae6   : > { %v2836_v58 = vmul.f32 %v3208_v38, %v2815_v42  ;;  %v2769_v59 = vadd.f32 %v3302_v56, %v3175_v22  ;;  %v3303_v6 = vpop.f32.mrf.mxu1 }
 0xae8   : > { %v2840_v0 = vadd.f32 %v2836_v58, %v4910_v9  ;;  %v2818_v37 = vadd.f32 %v3330_v63, %v2769_v59  ;;  %v3304_v8 = vpop.f32.mrf.mxu1 }
 0xae9   : > { %v3305_v10 = vadd.f32 %v3304_v8, %v3303_v6 }
 0xaea   : > { %2844 = vst [vmem:[%s4462_s14] sm:$0xff] %v2840_v0  ;;  %v2837_v2 = vmul.f32 %v3208_v38, %v2818_v37  ;;  %v3306_v5 = vpop.f32.mrf.mxu1 }
 0xaeb   : > { %v2774_v13 = vadd.f32 %v3305_v10, %v3175_v22 }
 0xaec   : > { %v2841_v4 = vadd.f32 %v2837_v2, %v4917_v16  ;;  %v3307_v47 = vpop.f32.mrf.mxu1 }
 0xaed   : > { %v3308_v28 = vadd.f32 %v3307_v47, %v3306_v5 }
 0xaee   : > { %2845 = vst [vmem:[%s4462_s14 + $0x8] sm:$0xff] %v2841_v4 }
 0xaef   : > { %v2777_v23 = vadd.f32 %v3308_v28, %v3175_v22 }
 0xafe   : > { %v3331_v62 = vpop.f32.mrf.mxu1 }
 0xb00   : > { %v3332_v11 = vpop.f32.mrf.mxu1 }
 0xb01   : > { %v3333_v9 = vadd.f32 %v3332_v11, %v3331_v62 }
 0xb02   : > { %v3334_v19 = vpop.f32.mrf.mxu1 }
 0xb03   : > { %v2823_v31 = vadd.f32 %v3333_v9, %v2774_v13 }
 0xb04   : > { %v3335_v16 = vpop.f32.mrf.mxu1 }
 0xb05   : > { %v2838_v24 = vmul.f32 %v3208_v38, %v2823_v31  ;;  %v3336_v25 = vadd.f32 %v3335_v16, %v3334_v19 }
 0xb07   : > { %v2842_v34 = vadd.f32 %v2838_v24, %v4914_v12  ;;  %v2826_v35 = vadd.f32 %v3336_v25, %v2777_v23 }
 0xb09   : > { %2846 = vst [vmem:[%s4462_s14 + $0x10] sm:$0xff] %v2842_v34  ;;  %v2839_v36 = vmul.f32 %v3208_v38, %v2826_v35 }
 0xb0b   : > { %v2843_v7 = vadd.f32 %v2839_v36, %v4922_v18 }
 0xb0d   : > { %2847 = vst [vmem:[%s4462_s14 + $0x18] sm:$0xff] %v2843_v7 }
 0xb0e   : > { %4005 = shalt.err (!%p4002_p1)
}
 0xb0f   : > { %s4006_s10 = scalar_lea.hbm %s5098_s2, 512  ;;  %s4010_s15 = scalar_lea.hbm %s5239_s5, 2048 }
 0xb10   : > { %p4007_p11 = scmp.ne.s32.totalorder %s5098_s2, %s4006_s10  ;;  %p4011_p13 = scmp.lt.s32.totalorder %s5098_s2, %s5239_s5 }
 0xb11   : > { %p4012_p6 = scmp.lt.s32.totalorder %s4010_s15, %s4006_s10 }
 0xb12   : > { %p4008_p4 = pnand %p4007_p11, %p4408_p7 }
 0xb13   : > { %p4013_p10 = por %p4012_p6, %p4011_p13 }
 0xb14   : > { %p4009_p8 = pneg %p4008_p4 }
 0xb16   : > { %p4014_p12 = pnand %p4013_p10, %p4009_p8 }
 0xb18   : > { %4017 = shalt.err (!%p4014_p12)
}
 0xb19   : > { %s4158_s7 = smov 128   ;;  %s4159_s24 = smov 8  }
 0xb1a   : > { %3451 = dma.vmem_to_hbm [thread:$0]  (%p4408_p7), %s5100_s3, 512, %s5098_s2, %s5106_s12, %s4158_s7, %s4158_s7, %s4159_s24  }
 0xb1b PF: > { %p3493_p0 = scmp.ge.s32.totalorder %s4128_s28, 2  ;;  %s2879_s8 = sand.u32 1, %s4088_s18  }
 0xb1c   : > { %s2880_s6 = scalar_lea.sflag [#allocation8], %s2879_s8 }
 0xb1d   : > { %p3477_p3 = pnand %p3493_p0, %p4418_p9 }
 0xb1f   : > { %p3478_p5 = pneg %p3477_p3 }
 0xb21   : > { %4083 = dma.done.wait (%p3478_p5), %s2880_s6, 512  }
 0xb22   : > { %4085 = vsyncadd (%p3478_p5), %s2880_s6, 4294966784  ;;  %s34_s28 = sadd.s32 1, %s4128_s28   ;;  %s5240_s11 = sld [smem:[#allocation26_spill]] }
 0xb23   : > { %p31_p2 = scmp.ge.s32.totalorder %s34_s28, 6   ;;  %s5241_s18 = smov %s4092_s19 }
 0xb24   : > { %s5242_s19 = smov %s4096_s20  ;;  %s5243_s20 = smov %s4416_s1 }
 0xb25   : > { %s5244_s21 = smov %s4104_s22  ;;  %s5245_s22 = smov %s4108_s23 }
 0xb26   : > { %s5246_s23 = smov %s4413_s25  ;;  %s5247_s24 = smov %s4120_s26 }
 0xb27   : > { %s5248_s25 = smov %s4124_s27  ;;  %s5249_s26 = smov %s5252_s29 }
 0xb28   : > { %s5250_s27 = smov %s5240_s11  ;;  %33 = sbr.rel (!%p31_p2) target bundleno = 28 (0x1c), region = 188 }
 0xb2d   :  { %2885 = vsyncpa [#allocation7], 1 }
 0xb2e   :  { %2887 = vsyncpa [#allocation7 + $0x1], 1 }
 0xb2f   :  { %2888 = vsyncpa [#allocation10], 1 }
 0xb30   :  { %2889 = vsyncpa [#allocation13], 1 }
 0xb31   :  { %2890 = vsyncpa [#allocation16], 1 }
 0xb32   :  { %2891 = vsyncpa [#allocation8], 1 }
 0xb33   :  { %2893 = vsyncpa [#allocation8 + $0x1], 1 }

</bundles_post_ra>
